<compile_context>
chip_gen: v7x
topology: tpu7x:2x2x1
jax: 0.10.0
libtpu: 0.0.40
codegen_flags: <defaults>
</compile_context>

<pallas_src>
import math

import jax
import jax.numpy as jnp
from jax import lax
from jax.experimental import pallas as pl
from jax.experimental.pallas import tpu as pltpu

# ---- problem sizes (small, consistent with the module) ----
B, S, D = 2, 16, 32          # batch*frames, query sequence, dim
H, DH = 2, 16                # num_attention_heads, attention_head_dim (H*DH == D)
SE, DC = 8, 24               # encoder sequence length, cross_attention_dim
FF_INNER = 4 * D             # GEGLU inner dim (FeedForward mult=4)
EPS = 1e-5                   # nn.LayerNorm default eps

BS = B * S                   # folded query rows
BSE = B * SE                 # folded encoder rows


# ------------------------- in-kernel helpers -------------------------
def _layer_norm(x, gamma, beta):
    # x: (N, D); gamma/beta: (1, D)
    mu = jnp.mean(x, axis=-1, keepdims=True)
    var = jnp.mean(jnp.square(x - mu), axis=-1, keepdims=True)
    return (x - mu) * lax.rsqrt(var + EPS) * gamma + beta


def _erf(z):
    # Abramowitz & Stegun 7.1.26 (max abs err ~1.5e-7) — exact-erf GELU semantics
    # using only elementwise primitives guaranteed to lower on Mosaic.
    a = jnp.abs(z)
    t = 1.0 / (1.0 + 0.3275911 * a)
    poly = t * (0.254829592 + t * (-0.284496736 + t * (1.421413741
                + t * (-1.453152027 + t * 1.061405429))))
    e = 1.0 - poly * jnp.exp(-a * a)
    return jnp.where(z >= 0.0, e, -e)


def _gelu_exact(x):
    return 0.5 * x * (1.0 + _erf(x * (1.0 / math.sqrt(2.0))))


def _attention(q, k, v, sq, skv, att_ref):
    # q: (B*sq, D) with the 1/sqrt(DH) scale already folded into Wq.
    # k, v: (B*skv, D).  Per-(batch, head) score/PV matmuls (B=2, H=2 static
    # unroll); each head's PV result lands in the (B*sq, D) VMEM scratch at a
    # static (row, col) offset so the output projection is one full-K matmul.
    for b in range(B):
        rq = slice(b * sq, (b + 1) * sq)
        rk = slice(b * skv, (b + 1) * skv)
        for h in range(H):
            c = slice(h * DH, (h + 1) * DH)
            qh = q[rq, c]                                               # (sq, DH)
            kh = k[rk, c]                                               # (skv, DH)
            vh = v[rk, c]                                               # (skv, DH)
            s = jnp.einsum('qd,kd->qk', qh, kh,
                           preferred_element_type=jnp.float32)          # (sq, skv)
            m = jnp.max(s, axis=-1, keepdims=True)
            p = jnp.exp(s - m)
            inv = pl.reciprocal(jnp.sum(p, axis=-1, keepdims=True),
                                approx=True)                            # EUP slot
            oh = jnp.dot(p, vh, preferred_element_type=jnp.float32) * inv
            att_ref[rq, c] = oh


# ------------------------------ kernel -------------------------------
def block_kernel(h_ref, enc_ref,
                 wqkv1_ref, wo1_ref,
                 wq2_ref, wkv2_ref, wo2_ref,
                 wff1_ref, bff1_ref, wff2_ref,
                 ln_ref, bias_ref,
                 out_ref, att_ref):
    x = h_ref[...]            # (B*S, D)  folded hidden states
    enc = enc_ref[...]        # (B*SE, DC) folded encoder states
    ln = ln_ref[...]          # (6, D): g1, b1, g2, b2, g3, b3
    bias = bias_ref[...]      # (3, D): attn1 out bias, attn2 out bias, FF out bias

    # --- self attention:  x = attn1(norm1(x)) + x ---
    n1 = _layer_norm(x, ln[0:1], ln[1:2])
    qkv = jnp.dot(n1, wqkv1_ref[...],
                  preferred_element_type=jnp.float32)                   # (BS, 3D)
    _attention(qkv[:, 0:D], qkv[:, D:2 * D], qkv[:, 2 * D:3 * D], S, S, att_ref)
    x = jnp.dot(att_ref[...], wo1_ref[...],
                preferred_element_type=jnp.float32) + bias[0:1] + x

    # --- cross attention: x = attn2(norm2(x), encoder) + x ---
    n2 = _layer_norm(x, ln[2:3], ln[3:4])
    q2 = jnp.dot(n2, wq2_ref[...], preferred_element_type=jnp.float32)  # (BS, D)
    kv = jnp.dot(enc, wkv2_ref[...], preferred_element_type=jnp.float32)  # (BSE, 2D)
    _attention(q2, kv[:, 0:D], kv[:, D:2 * D], S, SE, att_ref)
    x = jnp.dot(att_ref[...], wo2_ref[...],
                preferred_element_type=jnp.float32) + bias[1:2] + x

    # --- GEGLU feed-forward: x = ff(norm3(x)) + x ---
    n3 = _layer_norm(x, ln[4:5], ln[5:6])
    proj = jnp.dot(n3, wff1_ref[...],
                   preferred_element_type=jnp.float32) + bff1_ref[...]  # (BS, 2*FF_INNER)
    ge = proj[:, :FF_INNER] * _gelu_exact(proj[:, FF_INNER:])
    x = jnp.dot(ge, wff2_ref[...],
                preferred_element_type=jnp.float32) + bias[2:3] + x

    out_ref[...] = x


# ------------------------------ wrapper -------------------------------
@jax.jit
def basic_transformer_block(hidden, encoder, params):
    (g1, b1, wq1, wk1, wv1, wo1, bo1,
     g2, b2, wq2, wk2, wv2, wo2, bo2,
     g3, b3, wff1, bff1, wff2, bff2) = params

    scale = 1.0 / math.sqrt(DH)
    # Weight-only preprocessing (free, done once): fold attention scale into Wq,
    # fuse Q/K/V (self) and K/V (cross), coalesce tiny vectors into slabs.
    wqkv1 = jnp.concatenate([wq1 * scale, wk1, wv1], axis=1)    # (D, 3D)
    wq2s = wq2 * scale                                          # (D, D)
    wkv2 = jnp.concatenate([wk2, wv2], axis=1)                  # (DC, 2D)
    ln_gb = jnp.concatenate([g1, b1, g2, b2, g3, b3], axis=0)   # (6, D)
    bias_d = jnp.concatenate([bo1, bo2, bff2], axis=0)          # (3, D)

    hidden2d = hidden.reshape(BS, D)       # contiguous fold: free layout plumbing
    enc2d = encoder.reshape(BSE, DC)

    out2d = pl.pallas_call(
        block_kernel,
        out_shape=jax.ShapeDtypeStruct((BS, D), jnp.float32),
        scratch_shapes=[pltpu.VMEM((BS, D), jnp.float32)],      # per-head assembly
        input_output_aliases={0: 0},                            # reuse hidden buffer
    )(hidden2d, enc2d,
      wqkv1, wo1,
      wq2s, wkv2, wo2,
      wff1, bff1, wff2,
      ln_gb, bias_d)

    return out2d.reshape(B, S, D)


# --------------------- plain-JAX reference (check) ---------------------
def ref_forward(hidden, encoder, params):
    (g1, b1, wq1, wk1, wv1, wo1, bo1,
     g2, b2, wq2, wk2, wv2, wo2, bo2,
     g3, b3, wff1, bff1, wff2, bff2) = params

    def ln(x, g, b):
        mu = x.mean(-1, keepdims=True)
        var = ((x - mu) ** 2).mean(-1, keepdims=True)
        return (x - mu) / jnp.sqrt(var + EPS) * g + b

    def attn(x, ctx, wq, wk, wv, wo, bo):
        q, k, v = x @ wq, ctx @ wk, ctx @ wv
        Bq, Sq, _ = q.shape
        Sk = k.shape[1]
        q = q.reshape(Bq, Sq, H, DH).transpose(0, 2, 1, 3)
        k = k.reshape(Bq, Sk, H, DH).transpose(0, 2, 1, 3)
        v = v.reshape(Bq, Sk, H, DH).transpose(0, 2, 1, 3)
        s = jnp.einsum('bhqd,bhkd->bhqk', q, k) / math.sqrt(DH)
        p = jax.nn.softmax(s, axis=-1)
        o = jnp.einsum('bhqk,bhkd->bhqd', p, v)
        o = o.transpose(0, 2, 1, 3).reshape(Bq, Sq, H * DH)
        return o @ wo + bo

    h = hidden
    n1 = ln(h, g1, b1)
    h = attn(n1, n1, wq1, wk1, wv1, wo1, bo1) + h
    n2 = ln(h, g2, b2)
    h = attn(n2, encoder, wq2, wk2, wv2, wo2, bo2) + h
    n3 = ln(h, g3, b3)
    proj = n3 @ wff1 + bff1
    ge = proj[..., :FF_INNER] * jax.nn.gelu(proj[..., FF_INNER:], approximate=False)
    h = ge @ wff2 + bff2 + h
    return h


# -------------------------------- main ---------------------------------
if __name__ == "__main__":
    key = jax.random.PRNGKey(0)
    ks = iter(jax.random.split(key, 32))

    def w(shape, scale=0.05):
        return jax.random.normal(next(ks), shape, jnp.float32) * scale

    hidden = w((B, S, D), 1.0)
    encoder = w((B, SE, DC), 1.0)

    ones_d = jnp.ones((1, D), jnp.float32)
    zeros_d = jnp.zeros((1, D), jnp.float32)

    # Linear weights stored as (in, out) (transposed vs torch's (out, in)): y = x @ W + b
    params = [
        ones_d, zeros_d,                                          # norm1 gamma/beta
        w((D, D)), w((D, D)), w((D, D)), w((D, D)), w((1, D)),    # attn1 Wq,Wk,Wv,Wo,bo
        ones_d, zeros_d,                                          # norm2 gamma/beta
        w((D, D)), w((DC, D)), w((DC, D)), w((D, D)), w((1, D)),  # attn2 Wq,Wk,Wv,Wo,bo
        ones_d, zeros_d,                                          # norm3 gamma/beta
        w((D, 2 * FF_INNER)), w((1, 2 * FF_INNER)),               # GEGLU proj W,b
        w((FF_INNER, D)), w((1, D)),                              # FF out W,b
    ]

    out = basic_transformer_block(hidden, encoder, params)
    out = jax.block_until_ready(out)

    ref = ref_forward(hidden, encoder, params)
    assert out.shape == (B, S, D) and out.dtype == jnp.float32
    # Tolerance loosened slightly vs fp32-exact because the softmax denominator
    # uses the EUP approximate reciprocal and the erf uses a ~1.5e-7 expansion.
    assert jnp.allclose(out, ref, rtol=2e-3, atol=2e-3), float(jnp.max(jnp.abs(out - ref)))

    print("KERNEL_OK")
</pallas_src>

<mosaic_0001>
module attributes {stable_mosaic.version = 11 : i64} {
  func.func @block_kernel(%arg0: memref<32x32xf32, #tpu.memory_space<vmem>>, %arg1: memref<16x24xf32, #tpu.memory_space<vmem>>, %arg2: memref<32x96xf32, #tpu.memory_space<vmem>>, %arg3: memref<32x32xf32, #tpu.memory_space<vmem>>, %arg4: memref<32x32xf32, #tpu.memory_space<vmem>>, %arg5: memref<24x64xf32, #tpu.memory_space<vmem>>, %arg6: memref<32x32xf32, #tpu.memory_space<vmem>>, %arg7: memref<32x256xf32, #tpu.memory_space<vmem>>, %arg8: memref<1x256xf32, #tpu.memory_space<vmem>>, %arg9: memref<128x32xf32, #tpu.memory_space<vmem>>, %arg10: memref<6x32xf32, #tpu.memory_space<vmem>>, %arg11: memref<3x32xf32, #tpu.memory_space<vmem>>, %arg12: memref<32x32xf32, #tpu.memory_space<vmem>>, %arg13: memref<32x32xf32, #tpu.memory_space<vmem>>) attributes {dimension_semantics = [], scalar_prefetch = 0 : i64, scratch_operands = 1 : i64, tpu.core_type = #tpu.core_type<tc>} {
    %c0 = arith.constant 0 : index
    %c0_0 = arith.constant 0 : index
    %0 = vector.load %arg0[%c0, %c0_0] : memref<32x32xf32, #tpu.memory_space<vmem>>, vector<32x32xf32>
    %c0_1 = arith.constant 0 : index
    %c0_2 = arith.constant 0 : index
    %1 = vector.load %arg1[%c0_1, %c0_2] : memref<16x24xf32, #tpu.memory_space<vmem>>, vector<16x24xf32>
    %c0_3 = arith.constant 0 : index
    %c0_4 = arith.constant 0 : index
    %2 = vector.load %arg10[%c0_3, %c0_4] : memref<6x32xf32, #tpu.memory_space<vmem>>, vector<6x32xf32>
    %c0_5 = arith.constant 0 : index
    %c0_6 = arith.constant 0 : index
    %3 = vector.load %arg11[%c0_5, %c0_6] : memref<3x32xf32, #tpu.memory_space<vmem>>, vector<3x32xf32>
    %4 = vector.extract_strided_slice %2 {offsets = [0, 0], sizes = [1, 32], strides = [1, 1]} : vector<6x32xf32> to vector<1x32xf32>
    %5 = vector.extract_strided_slice %2 {offsets = [1, 0], sizes = [1, 32], strides = [1, 1]} : vector<6x32xf32> to vector<1x32xf32>
    %cst = arith.constant dense<0.000000e+00> : vector<32xf32>
    %6 = vector.multi_reduction <add>, %0, %cst [1] : vector<32x32xf32> to vector<32xf32>
    %7 = vector.shape_cast %6 : vector<32xf32> to vector<32x1xf32>
    %cst_7 = arith.constant 3.200000e+01 : f32
    %8 = vector.broadcast %cst_7 : f32 to vector<32x1xf32>
    %9 = arith.divf %7, %8 : vector<32x1xf32>
    %10 = vector.broadcast %9 : vector<32x1xf32> to vector<32x32xf32>
    %11 = arith.subf %0, %10 : vector<32x32xf32>
    %12 = arith.mulf %11, %11 : vector<32x32xf32>
    %cst_8 = arith.constant dense<0.000000e+00> : vector<32xf32>
    %13 = vector.multi_reduction <add>, %12, %cst_8 [1] : vector<32x32xf32> to vector<32xf32>
    %14 = vector.shape_cast %13 : vector<32xf32> to vector<32x1xf32>
    %cst_9 = arith.constant 3.200000e+01 : f32
    %15 = vector.broadcast %cst_9 : f32 to vector<32x1xf32>
    %16 = arith.divf %14, %15 : vector<32x1xf32>
    %17 = vector.broadcast %9 : vector<32x1xf32> to vector<32x32xf32>
    %18 = arith.subf %0, %17 : vector<32x32xf32>
    %cst_10 = arith.constant 9.99999974E-6 : f32
    %19 = vector.broadcast %cst_10 : f32 to vector<32x1xf32>
    %20 = arith.addf %16, %19 : vector<32x1xf32>
    %21 = math.rsqrt %20 : vector<32x1xf32>
    %22 = vector.broadcast %21 : vector<32x1xf32> to vector<32x32xf32>
    %23 = arith.mulf %18, %22 : vector<32x32xf32>
    %24 = vector.broadcast %4 : vector<1x32xf32> to vector<32x32xf32>
    %25 = arith.mulf %23, %24 : vector<32x32xf32>
    %26 = vector.broadcast %5 : vector<1x32xf32> to vector<32x32xf32>
    %27 = arith.addf %25, %26 : vector<32x32xf32>
    %c0_11 = arith.constant 0 : index
    %c0_12 = arith.constant 0 : index
    %28 = vector.load %arg2[%c0_11, %c0_12] : memref<32x96xf32, #tpu.memory_space<vmem>>, vector<32x96xf32>
    %cst_13 = arith.constant dense<0.000000e+00> : vector<32x96xf32>
    %29 = tpu.matmul %27, %28, %cst_13 {dimension_numbers = #tpu.dot_dimension_numbers<[1], [0], [0], [1], [0, 0, 1, 1], [], []>} : vector<32x32xf32>, vector<32x96xf32>, vector<32x96xf32> -> vector<32x96xf32>
    %30 = vector.extract_strided_slice %29 {offsets = [0, 0], sizes = [32, 32], strides = [1, 1]} : vector<32x96xf32> to vector<32x32xf32>
    %31 = vector.extract_strided_slice %29 {offsets = [0, 32], sizes = [32, 32], strides = [1, 1]} : vector<32x96xf32> to vector<32x32xf32>
    %32 = vector.extract_strided_slice %29 {offsets = [0, 64], sizes = [32, 32], strides = [1, 1]} : vector<32x96xf32> to vector<32x32xf32>
    %33 = vector.extract_strided_slice %30 {offsets = [0, 0], sizes = [16, 16], strides = [1, 1]} : vector<32x32xf32> to vector<16x16xf32>
    %34 = vector.extract_strided_slice %31 {offsets = [0, 0], sizes = [16, 16], strides = [1, 1]} : vector<32x32xf32> to vector<16x16xf32>
    %35 = vector.extract_strided_slice %32 {offsets = [0, 0], sizes = [16, 16], strides = [1, 1]} : vector<32x32xf32> to vector<16x16xf32>
    "tpu.trace_start"() <{level = 10 : i32, message = "qd,kd->qk"}> : () -> ()
    %cst_14 = arith.constant dense<0.000000e+00> : vector<16x16xf32>
    %36 = tpu.matmul %33, %34, %cst_14 {dimension_numbers = #tpu.dot_dimension_numbers<[1], [1], [0], [0], [0, 0, 1, 0], [], []>} : vector<16x16xf32>, vector<16x16xf32>, vector<16x16xf32> -> vector<16x16xf32>
    "tpu.trace_stop"() : () -> ()
    %cst_15 = arith.constant dense<0xFF800000> : vector<16xf32>
    %37 = vector.multi_reduction <maximumf>, %36, %cst_15 [1] : vector<16x16xf32> to vector<16xf32>
    %38 = vector.shape_cast %37 : vector<16xf32> to vector<16x1xf32>
    %39 = vector.broadcast %38 : vector<16x1xf32> to vector<16x16xf32>
    %40 = arith.subf %36, %39 : vector<16x16xf32>
    %41 = math.exp %40 : vector<16x16xf32>
    %cst_16 = arith.constant dense<0.000000e+00> : vector<16xf32>
    %42 = vector.multi_reduction <add>, %41, %cst_16 [1] : vector<16x16xf32> to vector<16xf32>
    %43 = vector.shape_cast %42 : vector<16xf32> to vector<16x1xf32>
    %44 = tpu.reciprocal %43 {approx = true} : vector<16x1xf32> -> vector<16x1xf32>
    %cst_17 = arith.constant dense<0.000000e+00> : vector<16x16xf32>
    %45 = tpu.matmul %41, %35, %cst_17 {dimension_numbers = #tpu.dot_dimension_numbers<[1], [0], [0], [1], [0, 0, 1, 1], [], []>} : vector<16x16xf32>, vector<16x16xf32>, vector<16x16xf32> -> vector<16x16xf32>
    %46 = vector.broadcast %44 : vector<16x1xf32> to vector<16x16xf32>
    %47 = arith.mulf %45, %46 : vector<16x16xf32>
    %c0_18 = arith.constant 0 : index
    %c0_19 = arith.constant 0 : index
    %48 = vector.load %arg13[%c0_18, %c0_19] : memref<32x32xf32, #tpu.memory_space<vmem>>, vector<16x16xf32>
    tpu.vector_store %arg13[%c0_18, %c0_19], %47 {strides = array<i32>} : memref<32x32xf32, #tpu.memory_space<vmem>>, vector<16x16xf32>,
    %49 = vector.extract_strided_slice %30 {offsets = [0, 16], sizes = [16, 16], strides = [1, 1]} : vector<32x32xf32> to vector<16x16xf32>
    %50 = vector.extract_strided_slice %31 {offsets = [0, 16], sizes = [16, 16], strides = [1, 1]} : vector<32x32xf32> to vector<16x16xf32>
    %51 = vector.extract_strided_slice %32 {offsets = [0, 16], sizes = [16, 16], strides = [1, 1]} : vector<32x32xf32> to vector<16x16xf32>
    "tpu.trace_start"() <{level = 10 : i32, message = "qd,kd->qk"}> : () -> ()
    %cst_20 = arith.constant dense<0.000000e+00> : vector<16x16xf32>
    %52 = tpu.matmul %49, %50, %cst_20 {dimension_numbers = #tpu.dot_dimension_numbers<[1], [1], [0], [0], [0, 0, 1, 0], [], []>} : vector<16x16xf32>, vector<16x16xf32>, vector<16x16xf32> -> vector<16x16xf32>
    "tpu.trace_stop"() : () -> ()
    %cst_21 = arith.constant dense<0xFF800000> : vector<16xf32>
    %53 = vector.multi_reduction <maximumf>, %52, %cst_21 [1] : vector<16x16xf32> to vector<16xf32>
    %54 = vector.shape_cast %53 : vector<16xf32> to vector<16x1xf32>
    %55 = vector.broadcast %54 : vector<16x1xf32> to vector<16x16xf32>
    %56 = arith.subf %52, %55 : vector<16x16xf32>
    %57 = math.exp %56 : vector<16x16xf32>
    %cst_22 = arith.constant dense<0.000000e+00> : vector<16xf32>
    %58 = vector.multi_reduction <add>, %57, %cst_22 [1] : vector<16x16xf32> to vector<16xf32>
    %59 = vector.shape_cast %58 : vector<16xf32> to vector<16x1xf32>
    %60 = tpu.reciprocal %59 {approx = true} : vector<16x1xf32> -> vector<16x1xf32>
    %cst_23 = arith.constant dense<0.000000e+00> : vector<16x16xf32>
    %61 = tpu.matmul %57, %51, %cst_23 {dimension_numbers = #tpu.dot_dimension_numbers<[1], [0], [0], [1], [0, 0, 1, 1], [], []>} : vector<16x16xf32>, vector<16x16xf32>, vector<16x16xf32> -> vector<16x16xf32>
    %62 = vector.broadcast %60 : vector<16x1xf32> to vector<16x16xf32>
    %63 = arith.mulf %61, %62 : vector<16x16xf32>
    %c0_24 = arith.constant 0 : index
    %c16 = arith.constant 16 : index
    %64 = vector.load %arg13[%c0_24, %c16] : memref<32x32xf32, #tpu.memory_space<vmem>>, vector<16x16xf32>
    tpu.vector_store %arg13[%c0_24, %c16], %63 {strides = array<i32>} : memref<32x32xf32, #tpu.memory_space<vmem>>, vector<16x16xf32>,
    %65 = vector.extract_strided_slice %30 {offsets = [16, 0], sizes = [16, 16], strides = [1, 1]} : vector<32x32xf32> to vector<16x16xf32>
    %66 = vector.extract_strided_slice %31 {offsets = [16, 0], sizes = [16, 16], strides = [1, 1]} : vector<32x32xf32> to vector<16x16xf32>
    %67 = vector.extract_strided_slice %32 {offsets = [16, 0], sizes = [16, 16], strides = [1, 1]} : vector<32x32xf32> to vector<16x16xf32>
    "tpu.trace_start"() <{level = 10 : i32, message = "qd,kd->qk"}> : () -> ()
    %cst_25 = arith.constant dense<0.000000e+00> : vector<16x16xf32>
    %68 = tpu.matmul %65, %66, %cst_25 {dimension_numbers = #tpu.dot_dimension_numbers<[1], [1], [0], [0], [0, 0, 1, 0], [], []>} : vector<16x16xf32>, vector<16x16xf32>, vector<16x16xf32> -> vector<16x16xf32>
    "tpu.trace_stop"() : () -> ()
    %cst_26 = arith.constant dense<0xFF800000> : vector<16xf32>
    %69 = vector.multi_reduction <maximumf>, %68, %cst_26 [1] : vector<16x16xf32> to vector<16xf32>
    %70 = vector.shape_cast %69 : vector<16xf32> to vector<16x1xf32>
    %71 = vector.broadcast %70 : vector<16x1xf32> to vector<16x16xf32>
    %72 = arith.subf %68, %71 : vector<16x16xf32>
    %73 = math.exp %72 : vector<16x16xf32>
    %cst_27 = arith.constant dense<0.000000e+00> : vector<16xf32>
    %74 = vector.multi_reduction <add>, %73, %cst_27 [1] : vector<16x16xf32> to vector<16xf32>
    %75 = vector.shape_cast %74 : vector<16xf32> to vector<16x1xf32>
    %76 = tpu.reciprocal %75 {approx = true} : vector<16x1xf32> -> vector<16x1xf32>
    %cst_28 = arith.constant dense<0.000000e+00> : vector<16x16xf32>
    %77 = tpu.matmul %73, %67, %cst_28 {dimension_numbers = #tpu.dot_dimension_numbers<[1], [0], [0], [1], [0, 0, 1, 1], [], []>} : vector<16x16xf32>, vector<16x16xf32>, vector<16x16xf32> -> vector<16x16xf32>
    %78 = vector.broadcast %76 : vector<16x1xf32> to vector<16x16xf32>
    %79 = arith.mulf %77, %78 : vector<16x16xf32>
    %c16_29 = arith.constant 16 : index
    %c0_30 = arith.constant 0 : index
    %80 = vector.load %arg13[%c16_29, %c0_30] : memref<32x32xf32, #tpu.memory_space<vmem>>, vector<16x16xf32>
    tpu.vector_store %arg13[%c16_29, %c0_30], %79 {strides = array<i32>} : memref<32x32xf32, #tpu.memory_space<vmem>>, vector<16x16xf32>,
    %81 = vector.extract_strided_slice %30 {offsets = [16, 16], sizes = [16, 16], strides = [1, 1]} : vector<32x32xf32> to vector<16x16xf32>
    %82 = vector.extract_strided_slice %31 {offsets = [16, 16], sizes = [16, 16], strides = [1, 1]} : vector<32x32xf32> to vector<16x16xf32>
    %83 = vector.extract_strided_slice %32 {offsets = [16, 16], sizes = [16, 16], strides = [1, 1]} : vector<32x32xf32> to vector<16x16xf32>
    "tpu.trace_start"() <{level = 10 : i32, message = "qd,kd->qk"}> : () -> ()
    %cst_31 = arith.constant dense<0.000000e+00> : vector<16x16xf32>
    %84 = tpu.matmul %81, %82, %cst_31 {dimension_numbers = #tpu.dot_dimension_numbers<[1], [1], [0], [0], [0, 0, 1, 0], [], []>} : vector<16x16xf32>, vector<16x16xf32>, vector<16x16xf32> -> vector<16x16xf32>
    "tpu.trace_stop"() : () -> ()
    %cst_32 = arith.constant dense<0xFF800000> : vector<16xf32>
    %85 = vector.multi_reduction <maximumf>, %84, %cst_32 [1] : vector<16x16xf32> to vector<16xf32>
    %86 = vector.shape_cast %85 : vector<16xf32> to vector<16x1xf32>
    %87 = vector.broadcast %86 : vector<16x1xf32> to vector<16x16xf32>
    %88 = arith.subf %84, %87 : vector<16x16xf32>
    %89 = math.exp %88 : vector<16x16xf32>
    %cst_33 = arith.constant dense<0.000000e+00> : vector<16xf32>
    %90 = vector.multi_reduction <add>, %89, %cst_33 [1] : vector<16x16xf32> to vector<16xf32>
    %91 = vector.shape_cast %90 : vector<16xf32> to vector<16x1xf32>
    %92 = tpu.reciprocal %91 {approx = true} : vector<16x1xf32> -> vector<16x1xf32>
    %cst_34 = arith.constant dense<0.000000e+00> : vector<16x16xf32>
    %93 = tpu.matmul %89, %83, %cst_34 {dimension_numbers = #tpu.dot_dimension_numbers<[1], [0], [0], [1], [0, 0, 1, 1], [], []>} : vector<16x16xf32>, vector<16x16xf32>, vector<16x16xf32> -> vector<16x16xf32>
    %94 = vector.broadcast %92 : vector<16x1xf32> to vector<16x16xf32>
    %95 = arith.mulf %93, %94 : vector<16x16xf32>
    %c16_35 = arith.constant 16 : index
    %c16_36 = arith.constant 16 : index
    %96 = vector.load %arg13[%c16_35, %c16_36] : memref<32x32xf32, #tpu.memory_space<vmem>>, vector<16x16xf32>
    tpu.vector_store %arg13[%c16_35, %c16_36], %95 {strides = array<i32>} : memref<32x32xf32, #tpu.memory_space<vmem>>, vector<16x16xf32>,
    %c0_37 = arith.constant 0 : index
    %c0_38 = arith.constant 0 : index
    %97 = vector.load %arg13[%c0_37, %c0_38] : memref<32x32xf32, #tpu.memory_space<vmem>>, vector<32x32xf32>
    %c0_39 = arith.constant 0 : index
    %c0_40 = arith.constant 0 : index
    %98 = vector.load %arg3[%c0_39, %c0_40] : memref<32x32xf32, #tpu.memory_space<vmem>>, vector<32x32xf32>
    %cst_41 = arith.constant dense<0.000000e+00> : vector<32x32xf32>
    %99 = tpu.matmul %97, %98, %cst_41 {dimension_numbers = #tpu.dot_dimension_numbers<[1], [0], [0], [1], [0, 0, 1, 1], [], []>} : vector<32x32xf32>, vector<32x32xf32>, vector<32x32xf32> -> vector<32x32xf32>
    %100 = vector.extract_strided_slice %3 {offsets = [0, 0], sizes = [1, 32], strides = [1, 1]} : vector<3x32xf32> to vector<1x32xf32>
    %101 = vector.broadcast %100 : vector<1x32xf32> to vector<32x32xf32>
    %102 = arith.addf %99, %101 : vector<32x32xf32>
    %103 = arith.addf %102, %0 : vector<32x32xf32>
    %104 = vector.extract_strided_slice %2 {offsets = [2, 0], sizes = [1, 32], strides = [1, 1]} : vector<6x32xf32> to vector<1x32xf32>
    %105 = vector.extract_strided_slice %2 {offsets = [3, 0], sizes = [1, 32], strides = [1, 1]} : vector<6x32xf32> to vector<1x32xf32>
    %cst_42 = arith.constant dense<0.000000e+00> : vector<32xf32>
    %106 = vector.multi_reduction <add>, %103, %cst_42 [1] : vector<32x32xf32> to vector<32xf32>
    %107 = vector.shape_cast %106 : vector<32xf32> to vector<32x1xf32>
    %cst_43 = arith.constant 3.200000e+01 : f32
    %108 = vector.broadcast %cst_43 : f32 to vector<32x1xf32>
    %109 = arith.divf %107, %108 : vector<32x1xf32>
    %110 = vector.broadcast %109 : vector<32x1xf32> to vector<32x32xf32>
    %111 = arith.subf %103, %110 : vector<32x32xf32>
    %112 = arith.mulf %111, %111 : vector<32x32xf32>
    %cst_44 = arith.constant dense<0.000000e+00> : vector<32xf32>
    %113 = vector.multi_reduction <add>, %112, %cst_44 [1] : vector<32x32xf32> to vector<32xf32>
    %114 = vector.shape_cast %113 : vector<32xf32> to vector<32x1xf32>
    %cst_45 = arith.constant 3.200000e+01 : f32
    %115 = vector.broadcast %cst_45 : f32 to vector<32x1xf32>
    %116 = arith.divf %114, %115 : vector<32x1xf32>
    %117 = vector.broadcast %109 : vector<32x1xf32> to vector<32x32xf32>
    %118 = arith.subf %103, %117 : vector<32x32xf32>
    %cst_46 = arith.constant 9.99999974E-6 : f32
    %119 = vector.broadcast %cst_46 : f32 to vector<32x1xf32>
    %120 = arith.addf %116, %119 : vector<32x1xf32>
    %121 = math.rsqrt %120 : vector<32x1xf32>
    %122 = vector.broadcast %121 : vector<32x1xf32> to vector<32x32xf32>
    %123 = arith.mulf %118, %122 : vector<32x32xf32>
    %124 = vector.broadcast %104 : vector<1x32xf32> to vector<32x32xf32>
    %125 = arith.mulf %123, %124 : vector<32x32xf32>
    %126 = vector.broadcast %105 : vector<1x32xf32> to vector<32x32xf32>
    %127 = arith.addf %125, %126 : vector<32x32xf32>
    %c0_47 = arith.constant 0 : index
    %c0_48 = arith.constant 0 : index
    %128 = vector.load %arg4[%c0_47, %c0_48] : memref<32x32xf32, #tpu.memory_space<vmem>>, vector<32x32xf32>
    %cst_49 = arith.constant dense<0.000000e+00> : vector<32x32xf32>
    %129 = tpu.matmul %127, %128, %cst_49 {dimension_numbers = #tpu.dot_dimension_numbers<[1], [0], [0], [1], [0, 0, 1, 1], [], []>} : vector<32x32xf32>, vector<32x32xf32>, vector<32x32xf32> -> vector<32x32xf32>
    %c0_50 = arith.constant 0 : index
    %c0_51 = arith.constant 0 : index
    %130 = vector.load %arg5[%c0_50, %c0_51] : memref<24x64xf32, #tpu.memory_space<vmem>>, vector<24x64xf32>
    %cst_52 = arith.constant dense<0.000000e+00> : vector<16x64xf32>
    %131 = tpu.matmul %1, %130, %cst_52 {dimension_numbers = #tpu.dot_dimension_numbers<[1], [0], [0], [1], [0, 0, 1, 1], [], []>} : vector<16x24xf32>, vector<24x64xf32>, vector<16x64xf32> -> vector<16x64xf32>
    %132 = vector.extract_strided_slice %131 {offsets = [0, 0], sizes = [16, 32], strides = [1, 1]} : vector<16x64xf32> to vector<16x32xf32>
    %133 = vector.extract_strided_slice %131 {offsets = [0, 32], sizes = [16, 32], strides = [1, 1]} : vector<16x64xf32> to vector<16x32xf32>
    %134 = vector.extract_strided_slice %129 {offsets = [0, 0], sizes = [16, 16], strides = [1, 1]} : vector<32x32xf32> to vector<16x16xf32>
    %135 = vector.extract_strided_slice %132 {offsets = [0, 0], sizes = [8, 16], strides = [1, 1]} : vector<16x32xf32> to vector<8x16xf32>
    %136 = vector.extract_strided_slice %133 {offsets = [0, 0], sizes = [8, 16], strides = [1, 1]} : vector<16x32xf32> to vector<8x16xf32>
    "tpu.trace_start"() <{level = 10 : i32, message = "qd,kd->qk"}> : () -> ()
    %cst_53 = arith.constant dense<0.000000e+00> : vector<16x8xf32>
    %137 = tpu.matmul %134, %135, %cst_53 {dimension_numbers = #tpu.dot_dimension_numbers<[1], [1], [0], [0], [0, 0, 1, 0], [], []>} : vector<16x16xf32>, vector<8x16xf32>, vector<16x8xf32> -> vector<16x8xf32>
    "tpu.trace_stop"() : () -> ()
    %cst_54 = arith.constant dense<0xFF800000> : vector<16xf32>
    %138 = vector.multi_reduction <maximumf>, %137, %cst_54 [1] : vector<16x8xf32> to vector<16xf32>
    %139 = vector.shape_cast %138 : vector<16xf32> to vector<16x1xf32>
    %140 = vector.broadcast %139 : vector<16x1xf32> to vector<16x8xf32>
    %141 = arith.subf %137, %140 : vector<16x8xf32>
    %142 = math.exp %141 : vector<16x8xf32>
    %cst_55 = arith.constant dense<0.000000e+00> : vector<16xf32>
    %143 = vector.multi_reduction <add>, %142, %cst_55 [1] : vector<16x8xf32> to vector<16xf32>
    %144 = vector.shape_cast %143 : vector<16xf32> to vector<16x1xf32>
    %145 = tpu.reciprocal %144 {approx = true} : vector<16x1xf32> -> vector<16x1xf32>
    %cst_56 = arith.constant dense<0.000000e+00> : vector<16x16xf32>
    %146 = tpu.matmul %142, %136, %cst_56 {dimension_numbers = #tpu.dot_dimension_numbers<[1], [0], [0], [1], [0, 0, 1, 1], [], []>} : vector<16x8xf32>, vector<8x16xf32>, vector<16x16xf32> -> vector<16x16xf32>
    %147 = vector.broadcast %145 : vector<16x1xf32> to vector<16x16xf32>
    %148 = arith.mulf %146, %147 : vector<16x16xf32>
    %c0_57 = arith.constant 0 : index
    %c0_58 = arith.constant 0 : index
    %149 = vector.load %arg13[%c0_57, %c0_58] : memref<32x32xf32, #tpu.memory_space<vmem>>, vector<16x16xf32>
    tpu.vector_store %arg13[%c0_57, %c0_58], %148 {strides = array<i32>} : memref<32x32xf32, #tpu.memory_space<vmem>>, vector<16x16xf32>,
    %150 = vector.extract_strided_slice %129 {offsets = [0, 16], sizes = [16, 16], strides = [1, 1]} : vector<32x32xf32> to vector<16x16xf32>
    %151 = vector.extract_strided_slice %132 {offsets = [0, 16], sizes = [8, 16], strides = [1, 1]} : vector<16x32xf32> to vector<8x16xf32>
    %152 = vector.extract_strided_slice %133 {offsets = [0, 16], sizes = [8, 16], strides = [1, 1]} : vector<16x32xf32> to vector<8x16xf32>
    "tpu.trace_start"() <{level = 10 : i32, message = "qd,kd->qk"}> : () -> ()
    %cst_59 = arith.constant dense<0.000000e+00> : vector<16x8xf32>
    %153 = tpu.matmul %150, %151, %cst_59 {dimension_numbers = #tpu.dot_dimension_numbers<[1], [1], [0], [0], [0, 0, 1, 0], [], []>} : vector<16x16xf32>, vector<8x16xf32>, vector<16x8xf32> -> vector<16x8xf32>
    "tpu.trace_stop"() : () -> ()
    %cst_60 = arith.constant dense<0xFF800000> : vector<16xf32>
    %154 = vector.multi_reduction <maximumf>, %153, %cst_60 [1] : vector<16x8xf32> to vector<16xf32>
    %155 = vector.shape_cast %154 : vector<16xf32> to vector<16x1xf32>
    %156 = vector.broadcast %155 : vector<16x1xf32> to vector<16x8xf32>
    %157 = arith.subf %153, %156 : vector<16x8xf32>
    %158 = math.exp %157 : vector<16x8xf32>
    %cst_61 = arith.constant dense<0.000000e+00> : vector<16xf32>
    %159 = vector.multi_reduction <add>, %158, %cst_61 [1] : vector<16x8xf32> to vector<16xf32>
    %160 = vector.shape_cast %159 : vector<16xf32> to vector<16x1xf32>
    %161 = tpu.reciprocal %160 {approx = true} : vector<16x1xf32> -> vector<16x1xf32>
    %cst_62 = arith.constant dense<0.000000e+00> : vector<16x16xf32>
    %162 = tpu.matmul %158, %152, %cst_62 {dimension_numbers = #tpu.dot_dimension_numbers<[1], [0], [0], [1], [0, 0, 1, 1], [], []>} : vector<16x8xf32>, vector<8x16xf32>, vector<16x16xf32> -> vector<16x16xf32>
    %163 = vector.broadcast %161 : vector<16x1xf32> to vector<16x16xf32>
    %164 = arith.mulf %162, %163 : vector<16x16xf32>
    %c0_63 = arith.constant 0 : index
    %c16_64 = arith.constant 16 : index
    %165 = vector.load %arg13[%c0_63, %c16_64] : memref<32x32xf32, #tpu.memory_space<vmem>>, vector<16x16xf32>
    tpu.vector_store %arg13[%c0_63, %c16_64], %164 {strides = array<i32>} : memref<32x32xf32, #tpu.memory_space<vmem>>, vector<16x16xf32>,
    %166 = vector.extract_strided_slice %129 {offsets = [16, 0], sizes = [16, 16], strides = [1, 1]} : vector<32x32xf32> to vector<16x16xf32>
    %167 = vector.extract_strided_slice %132 {offsets = [8, 0], sizes = [8, 16], strides = [1, 1]} : vector<16x32xf32> to vector<8x16xf32>
    %168 = vector.extract_strided_slice %133 {offsets = [8, 0], sizes = [8, 16], strides = [1, 1]} : vector<16x32xf32> to vector<8x16xf32>
    "tpu.trace_start"() <{level = 10 : i32, message = "qd,kd->qk"}> : () -> ()
    %cst_65 = arith.constant dense<0.000000e+00> : vector<16x8xf32>
    %169 = tpu.matmul %166, %167, %cst_65 {dimension_numbers = #tpu.dot_dimension_numbers<[1], [1], [0], [0], [0, 0, 1, 0], [], []>} : vector<16x16xf32>, vector<8x16xf32>, vector<16x8xf32> -> vector<16x8xf32>
    "tpu.trace_stop"() : () -> ()
    %cst_66 = arith.constant dense<0xFF800000> : vector<16xf32>
    %170 = vector.multi_reduction <maximumf>, %169, %cst_66 [1] : vector<16x8xf32> to vector<16xf32>
    %171 = vector.shape_cast %170 : vector<16xf32> to vector<16x1xf32>
    %172 = vector.broadcast %171 : vector<16x1xf32> to vector<16x8xf32>
    %173 = arith.subf %169, %172 : vector<16x8xf32>
    %174 = math.exp %173 : vector<16x8xf32>
    %cst_67 = arith.constant dense<0.000000e+00> : vector<16xf32>
    %175 = vector.multi_reduction <add>, %174, %cst_67 [1] : vector<16x8xf32> to vector<16xf32>
    %176 = vector.shape_cast %175 : vector<16xf32> to vector<16x1xf32>
    %177 = tpu.reciprocal %176 {approx = true} : vector<16x1xf32> -> vector<16x1xf32>
    %cst_68 = arith.constant dense<0.000000e+00> : vector<16x16xf32>
    %178 = tpu.matmul %174, %168, %cst_68 {dimension_numbers = #tpu.dot_dimension_numbers<[1], [0], [0], [1], [0, 0, 1, 1], [], []>} : vector<16x8xf32>, vector<8x16xf32>, vector<16x16xf32> -> vector<16x16xf32>
    %179 = vector.broadcast %177 : vector<16x1xf32> to vector<16x16xf32>
    %180 = arith.mulf %178, %179 : vector<16x16xf32>
    %c16_69 = arith.constant 16 : index
    %c0_70 = arith.constant 0 : index
    %181 = vector.load %arg13[%c16_69, %c0_70] : memref<32x32xf32, #tpu.memory_space<vmem>>, vector<16x16xf32>
    tpu.vector_store %arg13[%c16_69, %c0_70], %180 {strides = array<i32>} : memref<32x32xf32, #tpu.memory_space<vmem>>, vector<16x16xf32>,
    %182 = vector.extract_strided_slice %129 {offsets = [16, 16], sizes = [16, 16], strides = [1, 1]} : vector<32x32xf32> to vector<16x16xf32>
    %183 = vector.extract_strided_slice %132 {offsets = [8, 16], sizes = [8, 16], strides = [1, 1]} : vector<16x32xf32> to vector<8x16xf32>
    %184 = vector.extract_strided_slice %133 {offsets = [8, 16], sizes = [8, 16], strides = [1, 1]} : vector<16x32xf32> to vector<8x16xf32>
    "tpu.trace_start"() <{level = 10 : i32, message = "qd,kd->qk"}> : () -> ()
    %cst_71 = arith.constant dense<0.000000e+00> : vector<16x8xf32>
    %185 = tpu.matmul %182, %183, %cst_71 {dimension_numbers = #tpu.dot_dimension_numbers<[1], [1], [0], [0], [0, 0, 1, 0], [], []>} : vector<16x16xf32>, vector<8x16xf32>, vector<16x8xf32> -> vector<16x8xf32>
    "tpu.trace_stop"() : () -> ()
    %cst_72 = arith.constant dense<0xFF800000> : vector<16xf32>
    %186 = vector.multi_reduction <maximumf>, %185, %cst_72 [1] : vector<16x8xf32> to vector<16xf32>
    %187 = vector.shape_cast %186 : vector<16xf32> to vector<16x1xf32>
    %188 = vector.broadcast %187 : vector<16x1xf32> to vector<16x8xf32>
    %189 = arith.subf %185, %188 : vector<16x8xf32>
    %190 = math.exp %189 : vector<16x8xf32>
    %cst_73 = arith.constant dense<0.000000e+00> : vector<16xf32>
    %191 = vector.multi_reduction <add>, %190, %cst_73 [1] : vector<16x8xf32> to vector<16xf32>
    %192 = vector.shape_cast %191 : vector<16xf32> to vector<16x1xf32>
    %193 = tpu.reciprocal %192 {approx = true} : vector<16x1xf32> -> vector<16x1xf32>
    %cst_74 = arith.constant dense<0.000000e+00> : vector<16x16xf32>
    %194 = tpu.matmul %190, %184, %cst_74 {dimension_numbers = #tpu.dot_dimension_numbers<[1], [0], [0], [1], [0, 0, 1, 1], [], []>} : vector<16x8xf32>, vector<8x16xf32>, vector<16x16xf32> -> vector<16x16xf32>
    %195 = vector.broadcast %193 : vector<16x1xf32> to vector<16x16xf32>
    %196 = arith.mulf %194, %195 : vector<16x16xf32>
    %c16_75 = arith.constant 16 : index
    %c16_76 = arith.constant 16 : index
    %197 = vector.load %arg13[%c16_75, %c16_76] : memref<32x32xf32, #tpu.memory_space<vmem>>, vector<16x16xf32>
    tpu.vector_store %arg13[%c16_75, %c16_76], %196 {strides = array<i32>} : memref<32x32xf32, #tpu.memory_space<vmem>>, vector<16x16xf32>,
    %c0_77 = arith.constant 0 : index
    %c0_78 = arith.constant 0 : index
    %198 = vector.load %arg13[%c0_77, %c0_78] : memref<32x32xf32, #tpu.memory_space<vmem>>, vector<32x32xf32>
    %c0_79 = arith.constant 0 : index
    %c0_80 = arith.constant 0 : index
    %199 = vector.load %arg6[%c0_79, %c0_80] : memref<32x32xf32, #tpu.memory_space<vmem>>, vector<32x32xf32>
    %cst_81 = arith.constant dense<0.000000e+00> : vector<32x32xf32>
    %200 = tpu.matmul %198, %199, %cst_81 {dimension_numbers = #tpu.dot_dimension_numbers<[1], [0], [0], [1], [0, 0, 1, 1], [], []>} : vector<32x32xf32>, vector<32x32xf32>, vector<32x32xf32> -> vector<32x32xf32>
    %201 = vector.extract_strided_slice %3 {offsets = [1, 0], sizes = [1, 32], strides = [1, 1]} : vector<3x32xf32> to vector<1x32xf32>
    %202 = vector.broadcast %201 : vector<1x32xf32> to vector<32x32xf32>
    %203 = arith.addf %200, %202 : vector<32x32xf32>
    %204 = arith.addf %203, %103 : vector<32x32xf32>
    %205 = vector.extract_strided_slice %2 {offsets = [4, 0], sizes = [1, 32], strides = [1, 1]} : vector<6x32xf32> to vector<1x32xf32>
    %206 = vector.extract_strided_slice %2 {offsets = [5, 0], sizes = [1, 32], strides = [1, 1]} : vector<6x32xf32> to vector<1x32xf32>
    %cst_82 = arith.constant dense<0.000000e+00> : vector<32xf32>
    %207 = vector.multi_reduction <add>, %204, %cst_82 [1] : vector<32x32xf32> to vector<32xf32>
    %208 = vector.shape_cast %207 : vector<32xf32> to vector<32x1xf32>
    %cst_83 = arith.constant 3.200000e+01 : f32
    %209 = vector.broadcast %cst_83 : f32 to vector<32x1xf32>
    %210 = arith.divf %208, %209 : vector<32x1xf32>
    %211 = vector.broadcast %210 : vector<32x1xf32> to vector<32x32xf32>
    %212 = arith.subf %204, %211 : vector<32x32xf32>
    %213 = arith.mulf %212, %212 : vector<32x32xf32>
    %cst_84 = arith.constant dense<0.000000e+00> : vector<32xf32>
    %214 = vector.multi_reduction <add>, %213, %cst_84 [1] : vector<32x32xf32> to vector<32xf32>
    %215 = vector.shape_cast %214 : vector<32xf32> to vector<32x1xf32>
    %cst_85 = arith.constant 3.200000e+01 : f32
    %216 = vector.broadcast %cst_85 : f32 to vector<32x1xf32>
    %217 = arith.divf %215, %216 : vector<32x1xf32>
    %218 = vector.broadcast %210 : vector<32x1xf32> to vector<32x32xf32>
    %219 = arith.subf %204, %218 : vector<32x32xf32>
    %cst_86 = arith.constant 9.99999974E-6 : f32
    %220 = vector.broadcast %cst_86 : f32 to vector<32x1xf32>
    %221 = arith.addf %217, %220 : vector<32x1xf32>
    %222 = math.rsqrt %221 : vector<32x1xf32>
    %223 = vector.broadcast %222 : vector<32x1xf32> to vector<32x32xf32>
    %224 = arith.mulf %219, %223 : vector<32x32xf32>
    %225 = vector.broadcast %205 : vector<1x32xf32> to vector<32x32xf32>
    %226 = arith.mulf %224, %225 : vector<32x32xf32>
    %227 = vector.broadcast %206 : vector<1x32xf32> to vector<32x32xf32>
    %228 = arith.addf %226, %227 : vector<32x32xf32>
    %c0_87 = arith.constant 0 : index
    %c0_88 = arith.constant 0 : index
    %229 = vector.load %arg7[%c0_87, %c0_88] : memref<32x256xf32, #tpu.memory_space<vmem>>, vector<32x256xf32>
    %cst_89 = arith.constant dense<0.000000e+00> : vector<32x256xf32>
    %230 = tpu.matmul %228, %229, %cst_89 {dimension_numbers = #tpu.dot_dimension_numbers<[1], [0], [0], [1], [0, 0, 1, 1], [], []>} : vector<32x32xf32>, vector<32x256xf32>, vector<32x256xf32> -> vector<32x256xf32>
    %c0_90 = arith.constant 0 : index
    %c0_91 = arith.constant 0 : index
    %231 = vector.load %arg8[%c0_90, %c0_91] : memref<1x256xf32, #tpu.memory_space<vmem>>, vector<1x256xf32>
    %232 = vector.broadcast %231 : vector<1x256xf32> to vector<32x256xf32>
    %233 = arith.addf %230, %232 : vector<32x256xf32>
    %234 = vector.extract_strided_slice %233 {offsets = [0, 0], sizes = [32, 128], strides = [1, 1]} : vector<32x256xf32> to vector<32x128xf32>
    %235 = vector.extract_strided_slice %233 {offsets = [0, 128], sizes = [32, 128], strides = [1, 1]} : vector<32x256xf32> to vector<32x128xf32>
    %cst_92 = arith.constant 5.000000e-01 : f32
    %236 = vector.broadcast %cst_92 : f32 to vector<32x128xf32>
    %237 = arith.mulf %236, %235 : vector<32x128xf32>
    %cst_93 = arith.constant 0.707106769 : f32
    %238 = vector.broadcast %cst_93 : f32 to vector<32x128xf32>
    %239 = arith.mulf %235, %238 : vector<32x128xf32>
    %240 = math.absf %239 : vector<32x128xf32>
    %cst_94 = arith.constant 0.327591091 : f32
    %241 = vector.broadcast %cst_94 : f32 to vector<32x128xf32>
    %242 = arith.mulf %241, %240 : vector<32x128xf32>
    %cst_95 = arith.constant 1.000000e+00 : f32
    %243 = vector.broadcast %cst_95 : f32 to vector<32x128xf32>
    %244 = arith.addf %243, %242 : vector<32x128xf32>
    %cst_96 = arith.constant 1.000000e+00 : f32
    %245 = vector.broadcast %cst_96 : f32 to vector<32x128xf32>
    %246 = arith.divf %245, %244 : vector<32x128xf32>
    %cst_97 = arith.constant 1.06140542 : f32
    %247 = vector.broadcast %cst_97 : f32 to vector<32x128xf32>
    %248 = arith.mulf %246, %247 : vector<32x128xf32>
    %cst_98 = arith.constant -1.45315206 : f32
    %249 = vector.broadcast %cst_98 : f32 to vector<32x128xf32>
    %250 = arith.addf %249, %248 : vector<32x128xf32>
    %251 = arith.mulf %246, %250 : vector<32x128xf32>
    %cst_99 = arith.constant 1.42141378 : f32
    %252 = vector.broadcast %cst_99 : f32 to vector<32x128xf32>
    %253 = arith.addf %252, %251 : vector<32x128xf32>
    %254 = arith.mulf %246, %253 : vector<32x128xf32>
    %cst_100 = arith.constant -0.284496725 : f32
    %255 = vector.broadcast %cst_100 : f32 to vector<32x128xf32>
    %256 = arith.addf %255, %254 : vector<32x128xf32>
    %257 = arith.mulf %246, %256 : vector<32x128xf32>
    %cst_101 = arith.constant 0.254829586 : f32
    %258 = vector.broadcast %cst_101 : f32 to vector<32x128xf32>
    %259 = arith.addf %258, %257 : vector<32x128xf32>
    %260 = arith.mulf %246, %259 : vector<32x128xf32>
    %cst_102 = arith.constant 0.000000e+00 : f32
    %261 = vector.broadcast %cst_102 : f32 to vector<32x128xf32>
    %262 = arith.subf %261, %240 : vector<32x128xf32>
    %263 = arith.mulf %262, %240 : vector<32x128xf32>
    %264 = math.exp %263 : vector<32x128xf32>
    %265 = arith.mulf %260, %264 : vector<32x128xf32>
    %cst_103 = arith.constant 1.000000e+00 : f32
    %266 = vector.broadcast %cst_103 : f32 to vector<32x128xf32>
    %267 = arith.subf %266, %265 : vector<32x128xf32>
    %cst_104 = arith.constant 0.000000e+00 : f32
    %268 = vector.broadcast %cst_104 : f32 to vector<32x128xf32>
    %269 = arith.cmpf oge, %239, %268 : vector<32x128xf32>
    %cst_105 = arith.constant 0.000000e+00 : f32
    %270 = vector.broadcast %cst_105 : f32 to vector<32x128xf32>
    %271 = arith.subf %270, %267 : vector<32x128xf32>
    %272 = arith.select %269, %267, %271 : vector<32x128xi1>, vector<32x128xf32>
    %cst_106 = arith.constant 1.000000e+00 : f32
    %273 = vector.broadcast %cst_106 : f32 to vector<32x128xf32>
    %274 = arith.addf %273, %272 : vector<32x128xf32>
    %275 = arith.mulf %237, %274 : vector<32x128xf32>
    %276 = arith.mulf %234, %275 : vector<32x128xf32>
    %c0_107 = arith.constant 0 : index
    %c0_108 = arith.constant 0 : index
    %277 = vector.load %arg9[%c0_107, %c0_108] : memref<128x32xf32, #tpu.memory_space<vmem>>, vector<128x32xf32>
    %cst_109 = arith.constant dense<0.000000e+00> : vector<32x32xf32>
    %278 = tpu.matmul %276, %277, %cst_109 {dimension_numbers = #tpu.dot_dimension_numbers<[1], [0], [0], [1], [0, 0, 1, 1], [], []>} : vector<32x128xf32>, vector<128x32xf32>, vector<32x32xf32> -> vector<32x32xf32>
    %279 = vector.extract_strided_slice %3 {offsets = [2, 0], sizes = [1, 32], strides = [1, 1]} : vector<3x32xf32> to vector<1x32xf32>
    %280 = vector.broadcast %279 : vector<1x32xf32> to vector<32x32xf32>
    %281 = arith.addf %278, %280 : vector<32x32xf32>
    %282 = arith.addf %281, %204 : vector<32x32xf32>
    %c0_110 = arith.constant 0 : index
    %c0_111 = arith.constant 0 : index
    %283 = vector.load %arg12[%c0_110, %c0_111] : memref<32x32xf32, #tpu.memory_space<vmem>>, vector<32x32xf32>
    tpu.vector_store %arg12[%c0_110, %c0_111], %282 {strides = array<i32>} : memref<32x32xf32, #tpu.memory_space<vmem>>, vector<32x32xf32>,
    return
  }
}

</mosaic_0001>

<bundles_post_ra>
// kernel: basic_transformer_block.1
= control target key start
LH: loop header
LB: loop body
LE: loop exit
PB: predicated region body
PF: predicated region fallthrough
CT: control target
= control target key end

     0   :  { %vm49_vm0 = vcmask 261120   ;;  %v103_v36 = vlaneseq  ;;  %vm226_vm1 = vcmask 130048   ;;  %s3378_s19 = smov 80   ;;  %s3379_s20 = smov 96   ;;  %vm629_vm3 = vcmask 261248   ;;  %s3992_s0 = inlined_call_operand.vmem [shape: f32[32,32], index: 0, kind: input, shape index: {}, may-alias: {0,12}]   ;;  %s3993_s2 = inlined_call_operand.vmem [shape: f32[32,96], index: 2, kind: input, shape index: {}]   ;;  %s3994_s10 = inlined_call_operand.vmem [shape: f32[6,32], index: 10, kind: input, shape index: {}]   ;;  %s3995_s3 = inlined_call_operand.vmem [shape: f32[32,32], index: 3, kind: input, shape index: {}]   ;;  %s3996_s11 = inlined_call_operand.vmem [shape: f32[3,32], index: 11, kind: input, shape index: {}]   ;;  %s3997_s4 = inlined_call_operand.vmem [shape: f32[32,32], index: 4, kind: input, shape index: {}]   ;;  %s3998_s5 = inlined_call_operand.vmem [shape: f32[24,64], index: 5, kind: input, shape index: {}]   ;;  %s3999_s1 = inlined_call_operand.vmem [shape: f32[16,24], index: 1, kind: input, shape index: {}]   ;;  %s4000_s6 = inlined_call_operand.vmem [shape: f32[32,32], index: 6, kind: input, shape index: {}]   ;;  %s4001_s7 = inlined_call_operand.vmem [shape: f32[32,256], index: 7, kind: input, shape index: {}]   ;;  %s4002_s9 = inlined_call_operand.vmem [shape: f32[128,32], index: 9, kind: input, shape index: {}]   ;;  %s4003_s8 = inlined_call_operand.vmem [shape: f32[1,256], index: 8, kind: input, shape index: {}]   ;;  %s4004_s12 = inlined_call_operand.vmem [shape: f32[32,32], index: 12, kind: output, shape index: {}, may-alias: {0,12}]  }
   0x1   :  { %v3453_v0 = vld [vmem:[%s3992_s0] sm:$0xff]  ;;  %v3458_v1 = vld [vmem:[%s3992_s0 + $0x10] sm:$0xff]  ;;  %v3463_v2 = vld [vmem:[%s3992_s0 + $0x8] sm:$0xff]  ;;  %s3380_s21 = smov 112   ;;  %s3381_s22 = smov 64   ;;  %vm1327_vm4 = vcmask 195584  }
   0x2   :  { %v50_v3 = vsel %vm49_vm0, %v3453_v0, 0.0  ;;  %v56_v4 = vsel %vm49_vm0, %v3458_v1, 0.0  ;;  %v3472_v5 = vld [vmem:[%s3992_s0 + $0x18] sm:$0xff]  ;;  %v53_v6 = vsel %vm49_vm0, %v3463_v2, 0.0  ;;  %v119_v28 = vld [vmem:[%s3993_s2] sm:$0xff]  ;;  %v120_v29 = vld [vmem:[%s3993_s2 + $0x8] sm:$0xff] }
   0x3   :  { %51 = vadd.xlane.f32.xlu0 %v50_v3  ;;  %57 = vadd.xlane.f32.xlu1 %v56_v4  ;;  %v59_v7 = vsel %vm49_vm0, %v3472_v5, 0.0  ;;  %v121_v30 = vld [vmem:[%s3993_s2 + $0x10] sm:$0xff]  ;;  %v3109_v31 = vpack.c.bf16 %v120_v29, %v119_v28  ;;  %v122_v32 = vld [vmem:[%s3993_s2 + $0x18] sm:$0xff]  ;;  %v3498_v42 = vshrl.u32 %v103_v36, 7  ;;  %v3506_v49 = vld [vmem:[%s3994_s10] sm:$0x3f] }
   0x4   :  { %v3113_v33 = vpack.c.bf16 %v122_v32, %v121_v30  ;;  %vm3536_vm2 = vmpackc.low %vm226_vm1, %vm226_vm1  ;;  %s3382_s23 = smov 48   ;;  %s3383_s24 = smov 16   ;;  %vm1493_vm5 = vcmask 64512  }
   0x5   :  { %3110 = vmatprep.subr.bf16.mxu0 %v3109_v31  ;;  %v3501_v47 = vsub.s32 0, %v3498_v42  ;;  %v3509_v50 = vsub.s32 1, %v3498_v42 }
   0x6   :  { %3112 = vmatpush3.bf16.msra.mxu0 %v3109_v31 }
   0x7   :  { %54 = vadd.xlane.f32.xlu0 %v53_v6  ;;  %60 = vadd.xlane.f32.xlu1 %v59_v7  ;;  %v106_v51 = vrot.slane %v3506_v49, %v3501_v47  ;;  %v114_v54 = vrot.slane %v3506_v49, %v3509_v50 }
   0x8   :  { %3114 = vmatprep.subr.bf16.mxu0 %v3113_v33 }
   0xa   :  { %3116 = vmatpush3.bf16.msra.mxu0 %v3113_v33 }
  0x90   :  { %v52_v8 = vpop.xlane.xlu0 %51  ;;  %v58_v9 = vpop.xlane.xlu1 %57 }
  0x91   :  { %v63_v10 = vmul.f32 0.03125, %v52_v8  ;;  %v65_v11 = vmul.f32 0.03125, %v58_v9 }
  0x93   :  { %v67_v12 = vsub.f32 %v3453_v0, %v63_v10  ;;  %v69_v13 = vsub.f32 %v3458_v1, %v65_v11 }
  0x94   :  { %v55_v14 = vpop.xlane.xlu0 %54  ;;  %v61_v15 = vpop.xlane.xlu1 %60 }
  0x95   :  { %v64_v16 = vmul.f32 0.03125, %v55_v14  ;;  %v66_v17 = vmul.f32 0.03125, %v61_v15  ;;  %v71_v18 = vmul.f32 %v67_v12, %v67_v12  ;;  %v73_v19 = vmul.f32 %v69_v13, %v69_v13 }
  0x97   :  { %v68_v20 = vsub.f32 %v3463_v2, %v64_v16  ;;  %v70_v21 = vsub.f32 %v3472_v5, %v66_v17  ;;  %v75_v22 = vsel %vm49_vm0, %v71_v18, 0.0  ;;  %v81_v23 = vsel %vm49_vm0, %v73_v19, 0.0 }
  0x98   :  { %76 = vadd.xlane.f32.xlu0 %v75_v22 }
  0x99   :  { %v72_v24 = vmul.f32 %v68_v20, %v68_v20  ;;  %v74_v25 = vmul.f32 %v70_v21, %v70_v21 }
  0x9b   :  { %v78_v26 = vsel %vm49_vm0, %v72_v24, 0.0  ;;  %v84_v27 = vsel %vm49_vm0, %v74_v25, 0.0 }
  0x9c   :  { %82 = vadd.xlane.f32.xlu0 %v81_v23  ;;  %79 = vadd.xlane.f32.xlu1 %v78_v26 }
  0xa0   :  { %85 = vadd.xlane.f32.xlu1 %v84_v27 }
 0x125   :  { %v77_v34 = vpop.xlane.xlu0 %76 }
 0x126   :  { %v87_v35 = vmul.f32 0.03125, %v77_v34 }
 0x128   :  { %v91_v37 = vadd.f32 1e-05, %v87_v35 }
 0x129   :  { %v80_v38 = vpop.xlane.xlu1 %79  ;;  %v83_v39 = vpop.xlane.xlu0 %82 }
 0x12a   :  { %3272 = vrsqrt.f32 %v91_v37  ;;  %v88_v40 = vmul.f32 0.03125, %v80_v38  ;;  %v89_v41 = vmul.f32 0.03125, %v83_v39 }
 0x12c   :  { %v92_v43 = vadd.f32 1e-05, %v88_v40  ;;  %v93_v44 = vadd.f32 1e-05, %v89_v41 }
 0x12d   :  { %v86_v45 = vpop.xlane.xlu1 %85 }
 0x12e   :  { %3274 = vrsqrt.f32 %v92_v43  ;;  %v90_v46 = vmul.f32 0.03125, %v86_v45 }
 0x12f   :  { %3276 = vrsqrt.f32 %v93_v44 }
 0x130   :  { %v94_v48 = vadd.f32 1e-05, %v90_v46 }
 0x132   :  { %3278 = vrsqrt.f32 %v94_v48 }
 0x134   :  { %v3273_v52 = vpop.eup %3272 }
 0x135   :  { %v99_v53 = vmul.f32 %v3273_v52, %v67_v12 }
 0x137   :  { %v107_v55 = vmul.f32 %v106_v51, %v99_v53 }
 0x138   :  { %v3275_v56 = vpop.eup %3274 }
 0x139   :  { %v3277_v57 = vpop.eup %3276  ;;  %v115_v58 = vadd.f32 %v114_v54, %v107_v55  ;;  %v100_v59 = vmul.f32 %v3275_v56, %v68_v20 }
 0x13a   :  { %v101_v60 = vmul.f32 %v3277_v57, %v69_v13 }
 0x13b   :  { %2918 = vmatprep.mubr.msk.f32.mxu0 %vm49_vm0, %v115_v58  ;;  %v108_v61 = vmul.f32 %v106_v51, %v100_v59 }
 0x13c   :  { %v3279_v62 = vpop.eup %3278  ;;  %v109_v63 = vmul.f32 %v106_v51, %v101_v60 }
 0x13d   :  { %v116_v3 = vadd.f32 %v114_v54, %v108_v61  ;;  %v102_v4 = vmul.f32 %v3279_v62, %v70_v21 }
 0x13e   :  { %v117_v6 = vadd.f32 %v114_v54, %v109_v63 }
 0x13f   :  { %2919 = vmatmul.mubr.msk.f32.vlgmr.msra.gmra.mrb[0].mxu0 %vm49_vm0, %v116_v3  ;;  %v110_v7 = vmul.f32 %v106_v51, %v102_v4 }
 0x140   :  { %2921 = vmatprep.mubr.msk.f32.mxu0 %vm49_vm0, %v117_v6 }
 0x141   :  { %v118_v8 = vadd.f32 %v114_v54, %v110_v7 }
 0x143   :  { %2922 = vmatmul.mubr.msk.f32.gmra.mrb[2].mxu0 %vm49_vm0, %v118_v8 }
 0x212   :  { %v2920_v9 = vpop.f32.mrb[0].mxu0 }
 0x213   :  { %v201_v10 = vpop.f32.mrb[1].mxu0 }
 0x214   :  { %2928 = vmatprep.mubr.msk.f32.mxu1 %vm226_vm1, %v201_v10  ;;  %v3520_v11 = vpack.i.bf16 %v2920_v9, %v201_v10 }
 0x216   :  { %3238 = vrot.lane.b32.xlu1 %v3520_v11, %s3378_s19  ;;  %3233 = vrot.lane.b32.xlu0 %v3520_v11, %s3379_s20  ;;  %v2923_v12 = vpop.f32.mrb[2].mxu0 }
 0x217   :  { %v211_v13 = vpop.f32.mrb[3].mxu0 }
 0x218   :  { %v3526_v14 = vpack.i.bf16 %v2923_v12, %v211_v13 }
 0x21a   :  { %421 = vrot.lane.b32.xlu1 %v201_v10, %s3380_s21  ;;  %423 = vrot.lane.b32.xlu0 %v2920_v9, %s3380_s21 }
 0x21e   :  { %3243 = vrot.lane.b32.xlu1 %v3526_v14, %s3379_s20 }
 0x222   :  { %3248 = vrot.lane.b32.xlu1 %v3520_v11, %s3381_s22 }
 0x288   :  { %v3239_v15 = vpop.permute.xlu1 %3238  ;;  %v3234_v16 = vpop.permute.xlu0 %3233 }
 0x289   :  { %v3241_v17 = vunpack.i.h.bf16 %v3239_v15  ;;  %v3240_v18 = vunpack.i.l.bf16 %v3239_v15  ;;  %v3236_v19 = vunpack.i.h.bf16 %v3234_v16  ;;  %v3235_v20 = vunpack.i.l.bf16 %v3234_v16 }
 0x28b   :  { %v3127_v22 = vpack.c.bf16 %v3241_v17, %v3240_v18  ;;  %v3117_v23 = vpack.c.bf16 %v3236_v19, %v3235_v20 }
 0x28c   :  { %v422_v24 = vpop.permute.xlu1 %421  ;;  %v424_v30 = vpop.permute.xlu0 %423 }
 0x28d   :  { %3119 = vmatprep.subr.msk.bf16.mxu1 %vm3536_vm2, %v3117_v23  ;;  %3129 = vmatprep.subr.msk.bf16.mxu0 %vm3536_vm2, %v3127_v22 }
 0x28e   :  { %2942 = vmatprep.mubr.msk.f32.mxu0 %vm226_vm1, %v422_v24  ;;  %3122 = vmatpush3.bf16.xpose.msk.msra.mxu1 %vm3536_vm2, %v3117_v23 }
 0x28f   :  { %3132 = vmatpush3.bf16.xpose.msk.msra.mxu0 %vm3536_vm2, %v3127_v22 }
 0x290   :  { %v3244_v25 = vpop.permute.xlu1 %3243 }
 0x291   :  { %v3246_v26 = vunpack.i.h.bf16 %v3244_v25  ;;  %v3245_v27 = vunpack.i.l.bf16 %v3244_v25 }
 0x293   :  { %v3137_v28 = vpack.c.bf16 %v3246_v26, %v3245_v27 }
 0x294   :  { %v3249_v29 = vpop.permute.xlu1 %3248 }
 0x295   :  { %v3251_v31 = vunpack.i.h.bf16 %v3249_v29  ;;  %v3250_v32 = vunpack.i.l.bf16 %v3249_v29  ;;  %2929 = vmatmul.mubr.msk.f32.vlgmr.msra.gmra.mrb[0].mxu1 %vm226_vm1, %v2920_v9  ;;  %3139 = vmatprep.subr.msk.bf16.mxu0 %vm3536_vm2, %v3137_v28 }
 0x296   :  { %2943 = vmatmul.mubr.msk.f32.vlgmr.msra.gmra.mrb[4].mxu0 %vm226_vm1, %v424_v30 }
 0x297   :  { %v3123_v33 = vpack.c.bf16 %v3251_v31, %v3250_v32  ;;  %3142 = vmatpush3.bf16.xpose.msk.msra.mxu0 %vm3536_vm2, %v3137_v28  ;;  %2956 = vmatprep.mubr.msk.f32.mxu0 %vm226_vm1, %v211_v13 }
 0x299   :  { %3124 = vmatprep.subr.bf16.mxu1 %v3123_v33 }
 0x29a   :  { %3126 = vmatpush3.bf16.msra.mxu1 %v3123_v33 }
 0x29e   :  { %2957 = vmatmul.mubr.msk.f32.vlgmr.msra.gmra.mrb[6].mxu0 %vm226_vm1, %v2923_v12 }
 0x368   :  { %v2930_v34 = vpop.f32.mrb[0].mxu1 }
 0x369   :  { %v2944_v35 = vpop.f32.mrb[4].mxu0  ;;  %v301_v36 = vpop.f32.mrb[1].mxu1  ;;  %v313_v37 = vsel %vm226_vm1, %v2930_v34, -inf }
 0x36a   :  { %v503_v38 = vpop.f32.mrb[5].mxu0  ;;  %314 = vmax.xlane.f32.xlu0 %v313_v37  ;;  %v310_v39 = vsel %vm226_vm1, %v301_v36, -inf  ;;  %v515_v40 = vsel %vm226_vm1, %v2944_v35, -inf }
 0x36b   :  { %311 = vmax.xlane.f32.xlu1 %v310_v39  ;;  %v512_v43 = vsel %vm226_vm1, %v503_v38, -inf }
 0x36e   :  { %516 = vmax.xlane.f32.xlu0 %v515_v40 }
 0x371   :  { %v2958_v41 = vpop.f32.mrb[6].mxu0 }
 0x372   :  { %v712_v44 = vpop.f32.mrb[7].mxu0  ;;  %513 = vmax.xlane.f32.xlu0 %v512_v43  ;;  %v724_v45 = vsel %vm226_vm1, %v2958_v41, -inf }
 0x373   :  { %v721_v46 = vsel %vm226_vm1, %v712_v44, -inf }
 0x376   :  { %725 = vmax.xlane.f32.xlu0 %v724_v45 }
 0x37c   :  { %3258 = vrot.lane.b32.xlu1 %v3526_v14, %s3381_s22 }
 0x380   :  { %3263 = vrot.lane.b32.xlu1 %v3526_v14, %s3378_s19 }
 0x38c   :  { %3253 = vrot.lane.b32.xlu0 %v3520_v11, %s3382_s23 }
 0x390   :  { %834 = vrot.lane.b32.xlu0 %v2923_v12, %s3380_s21 }
 0x3a4   :  { %722 = vmax.xlane.f32.xlu1 %v721_v46 }
 0x3b5   :  { %832 = vrot.lane.b32.xlu1 %v211_v13, %s3380_s21 }
 0x3f7   :  { %v315_v48 = vpop.xlane.xlu0 %314 }
 0x3f8   :  { %v317_v51 = vsub.f32 %v2930_v34, %v315_v48  ;;  %v312_v52 = vpop.xlane.xlu1 %311 }
 0x3f9   :  { %v316_v53 = vsub.f32 %v301_v36, %v312_v52 }
 0x3fa   :  { %v320_v54 = vmul.f32 1.442695, %v317_v51 }
 0x3fb   :  { %v318_v55 = vmul.f32 1.442695, %v316_v53  ;;  %v517_v56 = vpop.xlane.xlu0 %516 }
 0x3fc   :  { %v519_v57 = vsub.f32 %v2944_v35, %v517_v56  ;;  %v3259_v62 = vpop.permute.xlu1 %3258 }
 0x3fd   :  { %3280 = vpow2.f32 %v318_v55  ;;  %v3261_v7 = vunpack.i.h.bf16 %v3259_v62  ;;  %v3260_v8 = vunpack.i.l.bf16 %v3259_v62 }
 0x3fe   :  { %3282 = vpow2.f32 %v320_v54  ;;  %v522_v60 = vmul.f32 1.442695, %v519_v57 }
 0x3ff   :  { %v514_v58 = vpop.xlane.xlu0 %513  ;;  %v3143_v13 = vpack.c.bf16 %v3261_v7, %v3260_v8 }
 0x400   :  { %v518_v59 = vsub.f32 %v503_v38, %v514_v58  ;;  %v3264_v11 = vpop.permute.xlu1 %3263 }
 0x401   :  { %v3266_v15 = vunpack.i.h.bf16 %v3264_v11  ;;  %v3265_v16 = vunpack.i.l.bf16 %v3264_v11 }
 0x402   :  { %v520_v61 = vmul.f32 1.442695, %v518_v59 }
 0x403   :  { %v726_v63 = vpop.xlane.xlu0 %725  ;;  %v3147_v19 = vpack.c.bf16 %v3266_v15, %v3265_v16 }
 0x404   :  { %3284 = vpow2.f32 %v520_v61  ;;  %v728_v20 = vsub.f32 %v2958_v41, %v726_v63 }
 0x405   :  { %3286 = vpow2.f32 %v522_v60 }
 0x406   :  { %v731_v24 = vmul.f32 1.442695, %v728_v20 }
 0x407   :  { %v3571_v3 = vpop.eup %3280  ;;  %v3254_v4 = vpop.permute.xlu0 %3253 }
 0x408   :  { %v3283_v6 = vpop.eup %3282  ;;  %v3256_v9 = vunpack.i.h.bf16 %v3254_v4  ;;  %v3255_v10 = vunpack.i.l.bf16 %v3254_v4  ;;  %2935 = vmatprep.mubr.msk.f32.mxu1 %vm226_vm1, %v3571_v3  ;;  %v322_v59 = vsel %vm226_vm1, %v3571_v3, 0.0  ;;  %v1046_v3 = vld [vmem:[%s3995_s3] sm:$0xff] }
 0x409   :  { %2936 = vmatmul.mubr.msk.f32.vlgmr.msra.gmra.mrb[2].mxu1 %vm226_vm1, %v3283_v6  ;;  %v325_v41 = vsel %vm226_vm1, %v3283_v6, 0.0 }
 0x40a   :  { %v3133_v12 = vpack.c.bf16 %v3256_v9, %v3255_v10  ;;  %v1047_v10 = vld [vmem:[%s3995_s3 + $0x8] sm:$0xff] }
 0x40b   :  { %v835_v29 = vpop.permute.xlu0 %834  ;;  %v3157_v11 = vpack.c.bf16 %v1047_v10, %v1046_v3 }
 0x40c   :  { %3134 = vmatprep.subr.bf16.mxu1 %v3133_v12 }
 0x40d   :  { %3136 = vmatpush3.bf16.msra.mxu1 %v3133_v12  ;;  %v1048_v12 = vld [vmem:[%s3995_s3 + $0x10] sm:$0xff] }
 0x40e   :  { %v3285_v17 = vpop.eup %3284  ;;  %3144 = vmatprep.subr.bf16.mxu1 %v3143_v13 }
 0x40f   :  { %v3287_v18 = vpop.eup %3286  ;;  %2949 = vmatprep.mubr.msk.f32.mxu1 %vm226_vm1, %v3285_v17  ;;  %v524_v39 = vsel %vm226_vm1, %v3285_v17, 0.0 }
 0x410   :  { %2950 = vmatmul.mubr.msk.f32.vlgmr.msra.gmra.mrb[4].mxu1 %vm226_vm1, %v3287_v18  ;;  %v527_v40 = vsel %vm226_vm1, %v3287_v18, 0.0 }
 0x411   :  { %3146 = vmatpush3.bf16.msra.mxu1 %v3143_v13  ;;  %v1049_v13 = vld [vmem:[%s3995_s3 + $0x18] sm:$0xff] }
 0x412   :  { %3149 = vmatprep.subr.msk.bf16.mxu1 %vm3536_vm2, %v3147_v19  ;;  %v3161_v15 = vpack.c.bf16 %v1049_v13, %v1048_v12  ;;  %v1225_v13 = vld [vmem:[%s3997_s4 + $0x10] sm:$0xff] }
 0x431   :  { %v723_v22 = vpop.xlane.xlu1 %722 }
 0x432   :  { %v727_v23 = vsub.f32 %v712_v44, %v723_v22 }
 0x434   :  { %v729_v25 = vmul.f32 1.442695, %v727_v23 }
 0x435   :  { %v833_v28 = vpop.permute.xlu1 %832 }
 0x436   :  { %3288 = vpow2.f32 %v729_v25 }
 0x437   :  { %3290 = vpow2.f32 %v731_v24 }
 0x440   :  { %v3289_v26 = vpop.eup %3288 }
 0x441   :  { %v3291_v27 = vpop.eup %3290  ;;  %2963 = vmatprep.mubr.msk.f32.mxu1 %vm226_vm1, %v3289_v26  ;;  %v733_v60 = vsel %vm226_vm1, %v3289_v26, 0.0 }
 0x442   :  { %2964 = vmatmul.mubr.msk.f32.vlgmr.msra.gmra.mrb[6].mxu1 %vm226_vm1, %v3291_v27  ;;  %v736_v62 = vsel %vm226_vm1, %v3291_v27, 0.0 }
 0x443   :  { %3152 = vmatpush3.bf16.xpose.msk.msra.mxu1 %vm3536_vm2, %v3147_v19  ;;  %2970 = vmatprep.mubr.msk.f32.mxu1 %vm226_vm1, %v833_v28 }
 0x44a   :  { %2971 = vmatmul.mubr.msk.f32.vlgmr.msra.gmra.mrb[8].mxu1 %vm226_vm1, %v835_v29 }
 0x4dc   :  { %v3586_v30 = vpop.f32.mrb[2].mxu1 }
 0x4dd   :  { %v3588_v31 = vpop.f32.mrb[3].mxu1 }
 0x4e3   :  { %v2951_v32 = vpop.f32.mrb[4].mxu1 }
 0x4e4   :  { %v610_v33 = vpop.f32.mrb[5].mxu1 }
 0x515   :  { %v3590_v34 = vpop.f32.mrb[6].mxu1 }
 0x516   :  { %v3592_v35 = vpop.f32.mrb[7].mxu1 }
 0x51d   :  { %v2972_v36 = vpop.f32.mrb[8].mxu1 }
 0x51e   :  { %v914_v37 = vpop.f32.mrb[9].mxu1  ;;  %v926_v21 = vsel %vm226_vm1, %v2972_v36, -inf }
 0x51f   :  { %927 = vmax.xlane.f32.xlu0 %v926_v21  ;;  %v923_v38 = vsel %vm226_vm1, %v914_v37, -inf }
 0x520   :  { %924 = vmax.xlane.f32.xlu1 %v923_v38 }
 0x524   :  { %525 = vadd.xlane.f32.xlu1 %v524_v39 }
 0x528   :  { %528 = vadd.xlane.f32.xlu1 %v527_v40 }
 0x535   :  { %3268 = vrot.lane.b32.xlu0 %v3526_v14, %s3382_s23 }
 0x554   :  { %326 = vadd.xlane.f32.xlu0 %v325_v41 }
 0x5ac   :  { %v928_v43 = vpop.xlane.xlu0 %927 }
 0x5ad   :  { %v930_v44 = vsub.f32 %v2972_v36, %v928_v43  ;;  %v925_v45 = vpop.xlane.xlu1 %924 }
 0x5ae   :  { %v929_v46 = vsub.f32 %v914_v37, %v925_v45 }
 0x5af   :  { %v933_v48 = vmul.f32 1.442695, %v930_v44  ;;  %v3644_v44 = vld [vmem:[%s3996_s11] sm:$0x7] }
 0x5b0   :  { %v931_v51 = vmul.f32 1.442695, %v929_v46  ;;  %v3269_v52 = vpop.permute.xlu0 %3268  ;;  %v1053_v45 = vrot.slane %v3644_v44, %v3501_v47 }
 0x5b1   :  { %v3271_v53 = vunpack.i.h.bf16 %v3269_v52  ;;  %v3270_v54 = vunpack.i.l.bf16 %v3269_v52  ;;  %v526_v61 = vpop.xlane.xlu1 %525 }
 0x5b2   :  { %3292 = vpow2.f32 %v931_v51 }
 0x5b3   :  { %3294 = vpow2.f32 %v933_v48  ;;  %v3153_v55 = vpack.c.bf16 %v3271_v53, %v3270_v54 }
 0x5b4   :  { %3296 = vrcp.f32 %v526_v61 }
 0x5b5   :  { %3154 = vmatprep.subr.bf16.mxu0 %v3153_v55  ;;  %v529_v63 = vpop.xlane.xlu1 %528 }
 0x5b6   :  { %3156 = vmatpush3.bf16.msra.mxu0 %v3153_v55  ;;  %3298 = vrcp.f32 %v529_v63 }
 0x5b7   :  { %3158 = vmatprep.subr.bf16.mxu0 %v3157_v11 }
 0x5bc   :  { %v3293_v56 = vpop.eup %3292 }
 0x5bd   :  { %v3295_v57 = vpop.eup %3294  ;;  %2977 = vmatprep.mubr.msk.f32.mxu0 %vm226_vm1, %v3293_v56  ;;  %v935_v14 = vsel %vm226_vm1, %v3293_v56, 0.0 }
 0x5be   :  { %2978 = vmatmul.mubr.msk.f32.vlgmr.msra.gmra.mrb[8].mxu0 %vm226_vm1, %v3295_v57  ;;  %936 = vadd.xlane.f32.xlu1 %v935_v14  ;;  %v938_v58 = vsel %vm226_vm1, %v3295_v57, 0.0  ;;  %v3297_v4 = vpop.eup %3296 }
 0x5bf   :  { %v619_v6 = vmul.f32 %v3297_v4, %v610_v33  ;;  %3160 = vmatpush3.bf16.msra.mxu0 %v3157_v11  ;;  %v1224_v11 = vld [vmem:[%s3997_s4 + $0x8] sm:$0xff] }
 0x5c0   :  { %v3299_v7 = vpop.eup %3298  ;;  %3162 = vmatprep.subr.bf16.mxu0 %v3161_v15 }
 0x5c1   :  { %v620_v9 = vmul.f32 %v3299_v7, %v2951_v32 }
 0x5c2   :  { %939 = vadd.xlane.f32.xlu1 %v938_v58 }
 0x5c3   :  { %3164 = vmatpush3.bf16.msra.mxu0 %v3161_v15  ;;  %v1226_v15 = vld [vmem:[%s3997_s4 + $0x18] sm:$0xff] }
 0x5c6   :  { %323 = vadd.xlane.f32.xlu1 %v322_v59 }
 0x5ca   :  { %734 = vadd.xlane.f32.xlu1 %v733_v60 }
 0x5ce   :  { %737 = vadd.xlane.f32.xlu1 %v736_v62 }
 0x5df   :  { %623 = vrot.lane.b32.xlu1 %v619_v6, %s3383_s24 }
 0x5e1   :  { %v327_v8 = vpop.xlane.xlu0 %326 }
 0x5e2   :  { %3300 = vrcp.f32 %v327_v8 }
 0x5e3   :  { %625 = vrot.lane.b32.xlu1 %v620_v9, %s3383_s24 }
 0x5ec   :  { %v3301_v16 = vpop.eup %3300 }
 0x5ed   :  { %v418_v17 = vmul.f32 %v3301_v16, %v3586_v30  ;;  %v3169_v16 = vpack.c.bf16 %v1226_v15, %v1225_v13 }
 0x5ef   :  { %420 = vst.msk [vmem:[#allocation2 + $0x8] sm:$0xff] %vm226_vm1, %v418_v17 }
 0x64b   :  { %v937_v18 = vpop.xlane.xlu1 %936 }
 0x64f   :  { %v940_v19 = vpop.xlane.xlu1 %939 }
 0x653   :  { %v324_v20 = vpop.xlane.xlu1 %323 }
 0x654   :  { %3302 = vrcp.f32 %v324_v20 }
 0x657   :  { %v735_v22 = vpop.xlane.xlu1 %734 }
 0x658   :  { %3304 = vrcp.f32 %v735_v22 }
 0x65b   :  { %v738_v23 = vpop.xlane.xlu1 %737 }
 0x65c   :  { %3306 = vrcp.f32 %v738_v23 }
 0x65d   :  { %3308 = vrcp.f32 %v940_v19 }
 0x65e   :  { %v3303_v24 = vpop.eup %3302  ;;  %3310 = vrcp.f32 %v937_v18 }
 0x65f   :  { %v417_v25 = vmul.f32 %v3303_v24, %v3588_v31  ;;  %v624_v26 = vpop.permute.xlu1 %623 }
 0x661   :  { %419 = vst.msk [vmem:[#allocation2] sm:$0xff] %vm226_vm1, %v417_v25 }
 0x662   :  { %v3305_v27 = vpop.eup %3304  ;;  %630 = vst.msk [vmem:[#allocation2] sm:$0xff] %vm629_vm3, %v624_v26 }
 0x663   :  { %v626_v28 = vpop.permute.xlu1 %625  ;;  %v828_v29 = vmul.f32 %v3305_v27, %v3592_v35 }
 0x664   :  { %631 = vst.msk [vmem:[#allocation2 + $0x8] sm:$0xff] %vm629_vm3, %v626_v28 }
 0x665   :  { %830 = vst.msk [vmem:[#allocation2 + $0x10] sm:$0xff] %vm226_vm1, %v828_v29 }
 0x666   :  { %v3307_v30 = vpop.eup %3306 }
 0x667   :  { %v829_v32 = vmul.f32 %v3307_v30, %v3590_v34  ;;  %v3309_v36 = vpop.eup %3308 }
 0x668   :  { %v3311_v35 = vpop.eup %3310 }
 0x669   :  { %v1042_v33 = vld [vmem:[#allocation2] sm:$0xff]  ;;  %831 = vst.msk [vmem:[#allocation2 + $0x18] sm:$0xff] %vm226_vm1, %v829_v32 }
 0x66a   :  { %2988 = vmatprep.mubr.msk.f32.mxu0 %vm49_vm0, %v1042_v33 }
 0x66b   :  { %v1043_v31 = vld [vmem:[#allocation2 + $0x8] sm:$0xff] }
 0x66c   :  { %2989 = vmatmul.mubr.msk.f32.vlgmr.msra.gmra.mrb[10].mxu0 %vm49_vm0, %v1043_v31 }
 0x691   :  { %v2979_v37 = vpop.f32.mrb[8].mxu0 }
 0x692   :  { %v1031_v21 = vmul.f32 %v3309_v36, %v2979_v37  ;;  %v1021_v38 = vpop.f32.mrb[9].mxu0  ;;  %v1209_v36 = vsub.s32 2, %v3498_v42  ;;  %v1217_v37 = vsub.s32 3, %v3498_v42 }
 0x693   :  { %v1030_v39 = vmul.f32 %v3311_v35, %v1021_v38 }
 0x694   :  { %1036 = vrot.lane.b32.xlu1 %v1031_v21, %s3383_s24  ;;  %v1210_v35 = vrot.slane %v3506_v49, %v1209_v36 }
 0x695   :  { %1034 = vrot.lane.b32.xlu0 %v1030_v39, %s3383_s24  ;;  %v1218_v39 = vrot.slane %v3506_v49, %v1217_v37  ;;  %v1326_v49 = vld [vmem:[%s3998_s5 + $0x10] sm:$0xff] }
 0x706   :  { %v1037_v34 = vpop.permute.xlu1 %1036 }
 0x707   :  { %1041 = vst.msk [vmem:[#allocation2 + $0x18] sm:$0xff] %vm629_vm3, %v1037_v34  ;;  %v1035_v40 = vpop.permute.xlu0 %1034 }
 0x708   :  { %1040 = vst.msk [vmem:[#allocation2 + $0x10] sm:$0xff] %vm629_vm3, %v1035_v40 }
 0x70e   :  { %v1045_v43 = vld [vmem:[#allocation2 + $0x18] sm:$0xff] }
 0x70f   :  { %v1044_v41 = vld [vmem:[#allocation2 + $0x10] sm:$0xff] }
 0x710   :  { %2991 = vmatprep.mubr.msk.f32.mxu0 %vm49_vm0, %v1044_v41 }
 0x711   :  { %2992 = vmatmul.mubr.msk.f32.gmra.mrb[12].mxu0 %vm49_vm0, %v1045_v43 }
 0x73f   :  { %v2990_v46 = vpop.f32.mrb[10].mxu0 }
 0x740   :  { %v1138_v48 = vadd.f32 %v2990_v46, %v1053_v45  ;;  %v1132_v51 = vpop.f32.mrb[11].mxu0 }
 0x741   :  { %v1133_v52 = vadd.f32 %v1132_v51, %v1053_v45  ;;  %v1325_v51 = vld [vmem:[%s3998_s5 + $0x8] sm:$0xff] }
 0x742   :  { %v3649_v53 = vadd.f32 %v1138_v48, %v3463_v2  ;;  %v1324_v48 = vld [vmem:[%s3998_s5] sm:$0xff] }
 0x743   :  { %v3652_v54 = vadd.f32 %v1133_v52, %v3453_v0  ;;  %v3173_v52 = vpack.c.bf16 %v1325_v51, %v1324_v48 }
 0x744   :  { %v1158_v55 = vsel %vm49_vm0, %v3649_v53, 0.0 }
 0x745   :  { %1159 = vadd.xlane.f32.xlu0 %v1158_v55  ;;  %v1155_v56 = vsel %vm49_vm0, %v3652_v54, 0.0 }
 0x746   :  { %1156 = vadd.xlane.f32.xlu1 %v1155_v56 }
 0x7d2   :  { %v1160_v62 = vpop.xlane.xlu0 %1159 }
 0x7d3   :  { %v1157_v57 = vpop.xlane.xlu1 %1156  ;;  %v1168_v0 = vmul.f32 0.03125, %v1160_v62 }
 0x7d4   :  { %v1167_v59 = vmul.f32 0.03125, %v1157_v57 }
 0x7d5   :  { %v1172_v7 = vsub.f32 %v3649_v53, %v1168_v0 }
 0x7d6   :  { %v1171_v63 = vsub.f32 %v3652_v54, %v1167_v59 }
 0x7d7   :  { %v1176_v3 = vmul.f32 %v1172_v7, %v1172_v7 }
 0x7d8   :  { %v1175_v9 = vmul.f32 %v1171_v63, %v1171_v63 }
 0x7d9   :  { %v1182_v10 = vsel %vm49_vm0, %v1176_v3, 0.0 }
 0x7e4   :  { %v2993_v14 = vpop.f32.mrb[12].mxu0 }
 0x7e5   :  { %v1142_v58 = vpop.f32.mrb[13].mxu0  ;;  %v1148_v60 = vadd.f32 %v2993_v14, %v1053_v45 }
 0x7e6   :  { %v1143_v61 = vadd.f32 %v1142_v58, %v1053_v45 }
 0x7e7   :  { %v3663_v4 = vadd.f32 %v1148_v60, %v3472_v5  ;;  %v1223_v5 = vld [vmem:[%s3997_s4] sm:$0xff] }
 0x7e8   :  { %v3659_v2 = vadd.f32 %v1143_v61, %v3458_v1  ;;  %v1179_v1 = vsel %vm49_vm0, %v1175_v9, 0.0  ;;  %v3165_v12 = vpack.c.bf16 %v1224_v11, %v1223_v5  ;;  %v45_v9 = vld [vmem:[%s3999_s1] sm:$0xff] }
 0x7e9   :  { %v1164_v8 = vsel %vm49_vm0, %v3663_v4, 0.0 }
 0x7ea   :  { %v1161_v6 = vsel %vm49_vm0, %v3659_v2, 0.0  ;;  %3166 = vmatprep.subr.bf16.mxu0 %v3165_v12 }
 0x7eb   :  { %1162 = vadd.xlane.f32.xlu1 %v1161_v6  ;;  %3168 = vmatpush3.bf16.msra.mxu0 %v3165_v12 }
 0x7ec   :  { %3170 = vmatprep.subr.bf16.mxu0 %v3169_v16 }
 0x7ef   :  { %1165 = vadd.xlane.f32.xlu1 %v1164_v8  ;;  %3172 = vmatpush3.bf16.msra.mxu0 %v3169_v16 }
 0x7f0   :  { %3174 = vmatprep.subr.bf16.mxu0 %v3173_v52 }
 0x7f3   :  { %1180 = vadd.xlane.f32.xlu1 %v1179_v1  ;;  %v46_v1 = vld [vmem:[%s3999_s1 + $0x8] sm:$0xff] }
 0x7f7   :  { %1183 = vadd.xlane.f32.xlu1 %v1182_v10 }
 0x878   :  { %v1163_v17 = vpop.xlane.xlu1 %1162 }
 0x879   :  { %v1169_v18 = vmul.f32 0.03125, %v1163_v17 }
 0x87b   :  { %v1173_v19 = vsub.f32 %v3659_v2, %v1169_v18 }
 0x87c   :  { %v1166_v20 = vpop.xlane.xlu1 %1165 }
 0x87d   :  { %v1170_v22 = vmul.f32 0.03125, %v1166_v20  ;;  %v1177_v23 = vmul.f32 %v1173_v19, %v1173_v19 }
 0x87f   :  { %v1174_v24 = vsub.f32 %v3663_v4, %v1170_v22  ;;  %v1185_v25 = vsel %vm49_vm0, %v1177_v23, 0.0 }
 0x880   :  { %1186 = vadd.xlane.f32.xlu0 %v1185_v25  ;;  %v1181_v26 = vpop.xlane.xlu1 %1180 }
 0x881   :  { %v1191_v27 = vmul.f32 0.03125, %v1181_v26  ;;  %v1178_v28 = vmul.f32 %v1174_v24, %v1174_v24 }
 0x883   :  { %v1195_v29 = vadd.f32 1e-05, %v1191_v27  ;;  %v1188_v30 = vsel %vm49_vm0, %v1178_v28, 0.0 }
 0x884   :  { %1189 = vadd.xlane.f32.xlu1 %v1188_v30  ;;  %v1184_v32 = vpop.xlane.xlu1 %1183 }
 0x885   :  { %3312 = vrsqrt.f32 %v1195_v29  ;;  %v1192_v33 = vmul.f32 0.03125, %v1184_v32 }
 0x887   :  { %v1196_v31 = vadd.f32 1e-05, %v1192_v33 }
 0x889   :  { %3314 = vrsqrt.f32 %v1196_v31 }
 0x88f   :  { %v3313_v21 = vpop.eup %3312 }
 0x890   :  { %v1203_v38 = vmul.f32 %v3313_v21, %v1171_v63 }
 0x892   :  { %v1211_v34 = vmul.f32 %v1210_v35, %v1203_v38 }
 0x893   :  { %v3315_v40 = vpop.eup %3314 }
 0x894   :  { %v1204_v41 = vmul.f32 %v3315_v40, %v1172_v7  ;;  %v1219_v43 = vadd.f32 %v1218_v39, %v1211_v34 }
 0x896   :  { %v1212_v45 = vmul.f32 %v1210_v35, %v1204_v41  ;;  %3002 = vmatprep.mubr.msk.f32.mxu0 %vm49_vm0, %v1219_v43 }
 0x898   :  { %v1220_v46 = vadd.f32 %v1218_v39, %v1212_v45 }
 0x89a   :  { %3003 = vmatmul.mubr.msk.f32.vlgmr.msra.gmra.mrb[14].mxu0 %vm49_vm0, %v1220_v46 }
 0x89b   :  { %3176 = vmatpush3.bf16.msra.mxu0 %v3173_v52 }
 0x89c   :  { %3012 = vmatprep.subr.mxu0 %v1326_v49 }
 0x89f   :  { %3013 = vmatpush3.msra.mxu0 %v1326_v49 }
 0x90d   :  { %v1187_v55 = vpop.xlane.xlu0 %1186 }
 0x90e   :  { %v1193_v56 = vmul.f32 0.03125, %v1187_v55 }
 0x910   :  { %v1197_v57 = vadd.f32 1e-05, %v1193_v56 }
 0x911   :  { %v1190_v14 = vpop.xlane.xlu1 %1189 }
 0x912   :  { %3316 = vrsqrt.f32 %v1197_v57  ;;  %v1194_v58 = vmul.f32 0.03125, %v1190_v14 }
 0x914   :  { %v1198_v59 = vadd.f32 1e-05, %v1194_v58 }
 0x916   :  { %3318 = vrsqrt.f32 %v1198_v59 }
 0x91c   :  { %v3317_v60 = vpop.eup %3316 }
 0x91d   :  { %v1205_v61 = vmul.f32 %v3317_v60, %v1173_v19 }
 0x91f   :  { %v1213_v62 = vmul.f32 %v1210_v35, %v1205_v61 }
 0x920   :  { %v3319_v0 = vpop.eup %3318 }
 0x921   :  { %v1221_v63 = vadd.f32 %v1218_v39, %v1213_v62  ;;  %v1206_v6 = vmul.f32 %v3319_v0, %v1174_v24 }
 0x923   :  { %3005 = vmatprep.mubr.msk.f32.mxu0 %vm49_vm0, %v1221_v63  ;;  %v1214_v7 = vmul.f32 %v1210_v35, %v1206_v6 }
 0x925   :  { %v1222_v8 = vadd.f32 %v1218_v39, %v1214_v7 }
 0x927   :  { %3006 = vmatmul.mubr.msk.f32.gmra.mrb[16].mxu0 %vm49_vm0, %v1222_v8 }
 0x928   :  { %3014 = vmatprep.mubr.msk.f32.mxu0 %vm1327_vm4, %v45_v9 }
 0x92b   :  { %3015 = vmatmul.mubr.msk.f32.vlgmr.msra.gmra.mrb[18].mxu0 %vm1327_vm4, %v46_v1 }
 0x96d   :  { %v3004_v3 = vpop.f32.mrb[14].mxu0 }
 0x96e   :  { %v1305_v10 = vpop.f32.mrb[15].mxu0 }
 0x96f   :  { %1602 = vrot.lane.b32.xlu1 %v1305_v10, %s3380_s21  ;;  %3019 = vmatprep.mubr.msk.f32.mxu1 %vm226_vm1, %v1305_v10 }
 0x973   :  { %1604 = vrot.lane.b32.xlu1 %v3004_v3, %s3380_s21 }
 0x9e1   :  { %v1603_v15 = vpop.permute.xlu1 %1602 }
 0x9e5   :  { %v1605_v17 = vpop.permute.xlu1 %1604 }
 0x9fa   :  { %v3007_v5 = vpop.f32.mrb[16].mxu0 }
 0x9fb   :  { %v1315_v11 = vpop.f32.mrb[17].mxu0 }
 0x9fc   :  { %1997 = vrot.lane.b32.xlu1 %v1315_v11, %s3380_s21 }
 0x9fe   :  { %v3717_v12 = vpop.f32.mrb[18].mxu0 }
 0x9ff   :  { %v1400_v13 = vpop.f32.mrb[19].mxu0 }
 0xa00   :  { %1709 = vrot.lane.b32.xlu1 %v1400_v13, %s3378_s19  ;;  %1606 = vrot.lane.b32.xlu0 %v1400_v13, %s3380_s21 }
 0xa01   :  { %3017 = vmatprep.subr.msk.mxu1 %vm226_vm1, %v1400_v13 }
 0xa02   :  { %3018 = vmatpush3.xpose.msk.msra.mxu1 %vm226_vm1, %v1400_v13 }
 0xa04   :  { %2001 = vrot.lane.b32.xlu0 %v3717_v12, %s3380_s21 }
 0xa05   :  { %3020 = vmatmul.mubr.msk.f32.vlgmr.msra.gmra.mrb[10].mxu1 %vm226_vm1, %v3004_v3 }
 0xa06   :  { %3029 = vmatprep.mubr.msk.f32.mxu1 %vm226_vm1, %v1603_v15 }
 0xa08   :  { %1999 = vrot.lane.b32.xlu0 %v3007_v5, %s3380_s21 }
 0xa0c   :  { %1514 = vrot.lane.b32.xlu0 %v1400_v13, %s3379_s20 }
 0xa6e   :  { %v1998_v19 = vpop.permute.xlu1 %1997 }
 0xa72   :  { %v1607_v16 = vpop.permute.xlu0 %1606  ;;  %v1710_v23 = vpop.permute.xlu1 %1709 }
 0xa73   :  { %3027 = vmatprep.subr.msk.mxu1 %vm226_vm1, %v1607_v16 }
 0xa74   :  { %3028 = vmatpush3.xpose.msk.msra.mxu1 %vm226_vm1, %v1607_v16 }
 0xa75   :  { %3037 = vmatprep.subr.msk.mxu1 %vm226_vm1, %v3717_v12 }
 0xa76   :  { %v2002_v18 = vpop.permute.xlu0 %2001 }
 0xa77   :  { %3030 = vmatmul.mubr.msk.f32.vlgmr.msra.gmra.mrb[12].mxu1 %vm226_vm1, %v1605_v17 }
 0xa78   :  { %3038 = vmatpush3.xpose.msk.msra.mxu1 %vm226_vm1, %v3717_v12  ;;  %3039 = vmatprep.mubr.msk.f32.mxu1 %vm226_vm1, %v1315_v11 }
 0xa79   :  { %3047 = vmatprep.subr.msk.mxu1 %vm226_vm1, %v2002_v18 }
 0xa7a   :  { %v2000_v20 = vpop.permute.xlu0 %1999 }
 0xa7b   :  { %3040 = vmatmul.mubr.msk.f32.vlgmr.msra.gmra.mrb[14].mxu1 %vm226_vm1, %v3007_v5 }
 0xa7c   :  { %3048 = vmatpush3.xpose.msk.msra.mxu1 %vm226_vm1, %v2002_v18  ;;  %3049 = vmatprep.mubr.msk.f32.mxu1 %vm226_vm1, %v1998_v19 }
 0xa7e   :  { %v1515_v22 = vpop.permute.xlu0 %1514 }
 0xa7f   :  { %3022 = vmatprep.subr.mxu0 %v1515_v22  ;;  %3050 = vmatmul.mubr.msk.f32.vlgmr.msra.gmra.mrb[16].mxu1 %vm226_vm1, %v2000_v20 }
 0xa80   :  { %3023 = vmatpush3.msra.mxu0 %v1515_v22 }
 0xa81   :  { %3032 = vmatprep.subr.mxu0 %v1710_v23 }
 0xad8   :  { %v3021_v24 = vpop.f32.mrb[10].mxu1 }
 0xad9   :  { %v1484_v25 = vpop.f32.mrb[11].mxu1  ;;  %v1497_v26 = vsel %vm1493_vm5, %v3021_v24, -inf }
 0xada   :  { %1498 = vmax.xlane.f32.xlu0 %v1497_v26  ;;  %v1494_v27 = vsel %vm1493_vm5, %v1484_v25, -inf }
 0xadb   :  { %1495 = vmax.xlane.f32.xlu1 %v1494_v27 }
 0xb4a   :  { %v3031_v28 = vpop.f32.mrb[12].mxu1 }
 0xb4b   :  { %v1680_v29 = vpop.f32.mrb[13].mxu1  ;;  %v1692_v30 = vsel %vm1493_vm5, %v3031_v28, -inf }
 0xb4c   :  { %1693 = vmax.xlane.f32.xlu1 %v1692_v30  ;;  %v1689_v32 = vsel %vm1493_vm5, %v1680_v29, -inf }
 0xb4d   :  { %1690 = vmax.xlane.f32.xlu0 %v1689_v32 }
 0xb4e   :  { %v3041_v33 = vpop.f32.mrb[14].mxu1 }
 0xb4f   :  { %v1880_v31 = vpop.f32.mrb[15].mxu1  ;;  %v1892_v37 = vsel %vm1493_vm5, %v3041_v33, -inf }
 0xb50   :  { %1893 = vmax.xlane.f32.xlu1 %v1892_v37  ;;  %v1889_v35 = vsel %vm1493_vm5, %v1880_v31, -inf }
 0xb51   :  { %1890 = vmax.xlane.f32.xlu0 %v1889_v35 }
 0xb52   :  { %v3051_v21 = vpop.f32.mrb[16].mxu1 }
 0xb53   :  { %v2075_v38 = vpop.f32.mrb[17].mxu1  ;;  %v2087_v39 = vsel %vm1493_vm5, %v3051_v21, -inf }
 0xb54   :  { %2088 = vmax.xlane.f32.xlu1 %v2087_v39  ;;  %v2084_v34 = vsel %vm1493_vm5, %v2075_v38, -inf }
 0xb55   :  { %2085 = vmax.xlane.f32.xlu0 %v2084_v34 }
 0xb65   :  { %1909 = vrot.lane.b32.xlu1 %v3717_v12, %s3379_s20 }
 0xb67   :  { %v1499_v40 = vpop.xlane.xlu0 %1498 }
 0xb68   :  { %v1501_v41 = vsub.f32 %v3021_v24, %v1499_v40  ;;  %v1496_v43 = vpop.xlane.xlu1 %1495  ;;  %v2204_v40 = vld [vmem:[%s4000_s6] sm:$0xff] }
 0xb69   :  { %v1500_v45 = vsub.f32 %v1484_v25, %v1496_v43  ;;  %v2206_v43 = vld [vmem:[%s4000_s6 + $0x10] sm:$0xff] }
 0xb6a   :  { %v1504_v46 = vmul.f32 1.442695, %v1501_v41  ;;  %v2205_v41 = vld [vmem:[%s4000_s6 + $0x8] sm:$0xff] }
 0xb6b   :  { %v1502_v48 = vmul.f32 1.442695, %v1500_v45  ;;  %2104 = vrot.lane.b32.xlu0 %v3717_v12, %s3378_s19 }
 0xb6d   :  { %3320 = vpow2.f32 %v1502_v48  ;;  %v2207_v48 = vld [vmem:[%s4000_s6 + $0x18] sm:$0xff] }
 0xb6e   :  { %3322 = vpow2.f32 %v1504_v46  ;;  %v3177_v46 = vpack.c.bf16 %v2205_v41, %v2204_v40 }
 0xb70   :  { %3178 = vmatprep.subr.bf16.mxu1 %v3177_v46 }
 0xb71   :  { %3180 = vmatpush3.bf16.msra.mxu1 %v3177_v46 }
 0xb77   :  { %v3321_v51 = vpop.eup %3320 }
 0xb78   :  { %v3323_v52 = vpop.eup %3322  ;;  %3024 = vmatprep.mubr.msk.f32.mxu0 %vm1493_vm5, %v3321_v51  ;;  %v1506_v24 = vsel %vm1493_vm5, %v3321_v51, 0.0  ;;  %v3181_v51 = vpack.c.bf16 %v2207_v48, %v2206_v43 }
 0xb79   :  { %3025 = vmatmul.mubr.msk.f32.vlgmr.msra.gmra.mrb[20].mxu0 %vm1493_vm5, %v3323_v52 }
 0xb7a   :  { %3033 = vmatpush3.msra.mxu0 %v1710_v23  ;;  %v1509_v23 = vsel %vm1493_vm5, %v3323_v52, 0.0  ;;  %3182 = vmatprep.subr.bf16.mxu1 %v3181_v51 }
 0xb7b   :  { %3184 = vmatpush3.bf16.msra.mxu1 %v3181_v51 }
 0xbd9   :  { %v1694_v49 = vpop.xlane.xlu1 %1693 }
 0xbda   :  { %v1696_v55 = vsub.f32 %v3031_v28, %v1694_v49  ;;  %v1691_v56 = vpop.xlane.xlu0 %1690 }
 0xbdb   :  { %v1695_v57 = vsub.f32 %v1680_v29, %v1691_v56 }
 0xbdc   :  { %v1699_v14 = vmul.f32 1.442695, %v1696_v55 }
 0xbdd   :  { %v1697_v58 = vmul.f32 1.442695, %v1695_v57  ;;  %v1894_v59 = vpop.xlane.xlu1 %1893 }
 0xbde   :  { %3324 = vpow2.f32 %v1699_v14  ;;  %v1896_v60 = vsub.f32 %v3041_v33, %v1894_v59  ;;  %v1891_v61 = vpop.xlane.xlu0 %1890 }
 0xbdf   :  { %3326 = vpow2.f32 %v1697_v58  ;;  %v1895_v62 = vsub.f32 %v1880_v31, %v1891_v61 }
 0xbe0   :  { %v1899_v0 = vmul.f32 1.442695, %v1896_v60 }
 0xbe1   :  { %v1897_v63 = vmul.f32 1.442695, %v1895_v62  ;;  %v2089_v6 = vpop.xlane.xlu1 %2088 }
 0xbe2   :  { %v2091_v7 = vsub.f32 %v3051_v21, %v2089_v6  ;;  %v2086_v8 = vpop.xlane.xlu0 %2085 }
 0xbe3   :  { %3328 = vpow2.f32 %v1897_v63  ;;  %v2090_v9 = vsub.f32 %v2075_v38, %v2086_v8 }
 0xbe4   :  { %3330 = vpow2.f32 %v1899_v0  ;;  %v2094_v1 = vmul.f32 1.442695, %v2091_v7 }
 0xbe5   :  { %v2092_v3 = vmul.f32 1.442695, %v2090_v9  ;;  %v1910_v10 = vpop.permute.xlu1 %1909 }
 0xbe6   :  { %3332 = vpow2.f32 %v2094_v1  ;;  %3042 = vmatprep.subr.mxu0 %v1910_v10  ;;  %v2105_v15 = vpop.permute.xlu0 %2104 }
 0xbe7   :  { %3334 = vpow2.f32 %v2092_v3 }
 0xbe8   :  { %v3325_v5 = vpop.eup %3324 }
 0xbe9   :  { %v3327_v11 = vpop.eup %3326  ;;  %v1704_v12 = vsel %vm1493_vm5, %v3325_v5, 0.0 }
 0xbea   :  { %3034 = vmatprep.mubr.msk.f32.mxu0 %vm1493_vm5, %v3327_v11  ;;  %1705 = vadd.xlane.f32.xlu0 %v1704_v12  ;;  %v1701_v13 = vsel %vm1493_vm5, %v3327_v11, 0.0 }
 0xbeb   :  { %1702 = vadd.xlane.f32.xlu1 %v1701_v13  ;;  %3035 = vmatmul.mubr.msk.f32.vlgmr.msra.gmra.mrb[22].mxu0 %vm1493_vm5, %v3325_v5 }
 0xbec   :  { %3043 = vmatpush3.msra.mxu0 %v1910_v10 }
 0xbed   :  { %v3329_v16 = vpop.eup %3328  ;;  %3052 = vmatprep.subr.mxu0 %v2105_v15 }
 0xbee   :  { %v3331_v17 = vpop.eup %3330  ;;  %3044 = vmatprep.mubr.msk.f32.mxu0 %vm1493_vm5, %v3329_v16  ;;  %v1901_v26 = vsel %vm1493_vm5, %v3329_v16, 0.0 }
 0xbef   :  { %3045 = vmatmul.mubr.msk.f32.vlgmr.msra.gmra.mrb[24].mxu0 %vm1493_vm5, %v3331_v17  ;;  %v1904_v25 = vsel %vm1493_vm5, %v3331_v17, 0.0  ;;  %v2211_v17 = vrot.slane %v3644_v44, %v3509_v50 }
 0xbf0   :  { %v3333_v18 = vpop.eup %3332  ;;  %3053 = vmatpush3.msra.mxu0 %v2105_v15 }
 0xbf1   :  { %v3335_v19 = vpop.eup %3334  ;;  %v2099_v20 = vsel %vm1493_vm5, %v3333_v18, 0.0 }
 0xbf2   :  { %2100 = vadd.xlane.f32.xlu1 %v2099_v20  ;;  %3054 = vmatprep.mubr.msk.f32.mxu0 %vm1493_vm5, %v3335_v19  ;;  %v2096_v22 = vsel %vm1493_vm5, %v3335_v19, 0.0 }
 0xbf3   :  { %2097 = vadd.xlane.f32.xlu0 %v2096_v22  ;;  %3055 = vmatmul.mubr.msk.f32.vlgmr.msra.gmra.mrb[26].mxu0 %vm1493_vm5, %v3333_v18 }
 0xbf6   :  { %1510 = vadd.xlane.f32.xlu1 %v1509_v23 }
 0xbf7   :  { %1507 = vadd.xlane.f32.xlu0 %v1506_v24 }
 0xbfa   :  { %1905 = vadd.xlane.f32.xlu1 %v1904_v25 }
 0xbfb   :  { %1902 = vadd.xlane.f32.xlu0 %v1901_v26 }
 0xc4c   :  { %v3026_v27 = vpop.f32.mrb[20].mxu0 }
 0xc4d   :  { %v1589_v28 = vpop.f32.mrb[21].mxu0 }
 0xc77   :  { %v1706_v30 = vpop.xlane.xlu0 %1705 }
 0xc78   :  { %v1703_v29 = vpop.xlane.xlu1 %1702 }
 0xc7f   :  { %v2101_v32 = vpop.xlane.xlu1 %2100 }
 0xc80   :  { %v2098_v33 = vpop.xlane.xlu0 %2097 }
 0xc83   :  { %v1511_v31 = vpop.xlane.xlu1 %1510 }
 0xc84   :  { %3336 = vrcp.f32 %v1511_v31  ;;  %v1508_v37 = vpop.xlane.xlu0 %1507 }
 0xc85   :  { %3338 = vrcp.f32 %v1508_v37 }
 0xc86   :  { %3340 = vrcp.f32 %v1706_v30 }
 0xc87   :  { %3342 = vrcp.f32 %v1703_v29  ;;  %v1906_v34 = vpop.xlane.xlu1 %1905 }
 0xc88   :  { %v1903_v45 = vpop.xlane.xlu0 %1902  ;;  %3344 = vrcp.f32 %v1906_v34 }
 0xc89   :  { %3346 = vrcp.f32 %v1903_v45 }
 0xc8a   :  { %3348 = vrcp.f32 %v2101_v32 }
 0xc8b   :  { %3350 = vrcp.f32 %v2098_v33 }
 0xc8e   :  { %v3337_v35 = vpop.eup %3336 }
 0xc8f   :  { %v3339_v21 = vpop.eup %3338  ;;  %v1599_v38 = vmul.f32 %v3337_v35, %v3026_v27 }
 0xc90   :  { %v1598_v39 = vmul.f32 %v3339_v21, %v1589_v28  ;;  %v3341_v52 = vpop.eup %3340 }
 0xc91   :  { %1601 = vst.msk [vmem:[#allocation2 + $0x8] sm:$0xff] %vm226_vm1, %v1599_v38  ;;  %v3343_v55 = vpop.eup %3342 }
 0xc92   :  { %1600 = vst.msk [vmem:[#allocation2] sm:$0xff] %vm226_vm1, %v1598_v39  ;;  %v3345_v58 = vpop.eup %3344 }
 0xc93   :  { %v3347_v60 = vpop.eup %3346 }
 0xc94   :  { %v3349_v63 = vpop.eup %3348 }
 0xc95   :  { %v3351_v7 = vpop.eup %3350 }
 0xcbe   :  { %v3036_v49 = vpop.f32.mrb[22].mxu0 }
 0xcbf   :  { %v1794_v56 = vmul.f32 %v3341_v52, %v3036_v49  ;;  %v1784_v57 = vpop.f32.mrb[23].mxu0 }
 0xcc0   :  { %v1793_v14 = vmul.f32 %v3343_v55, %v1784_v57  ;;  %v2384_v57 = vld [vmem:[%s4001_s7 + $0x18] sm:$0xff] }
 0xcc1   :  { %1799 = vrot.lane.b32.xlu1 %v1794_v56, %s3383_s24  ;;  %v2382_v56 = vld [vmem:[%s4001_s7 + $0x8] sm:$0xff] }
 0xcc2   :  { %v3046_v59 = vpop.f32.mrb[24].mxu0  ;;  %1797 = vrot.lane.b32.xlu0 %v1793_v14, %s3383_s24  ;;  %v3185_v14 = vpack.c.bf16 %v2384_v57, %v2382_v56  ;;  %v2621_v56 = vld [vmem:[%s4002_s9 + $0x38] sm:$0xff] }
 0xcc3   :  { %v1994_v61 = vmul.f32 %v3345_v58, %v3046_v59  ;;  %v1984_v62 = vpop.f32.mrb[25].mxu0  ;;  %v2381_v58 = vld [vmem:[%s4001_s7] sm:$0xff]  ;;  %v2383_v59 = vld [vmem:[%s4001_s7 + $0x10] sm:$0xff] }
 0xcc4   :  { %v1993_v0 = vmul.f32 %v3347_v60, %v1984_v62  ;;  %v3187_v60 = vpack.c.bf16 %v2383_v59, %v2381_v58  ;;  %3186 = vmatprep.subr.bf16.mxu0 %v3185_v14  ;;  %v2388_v62 = vld [vmem:[%s4001_s7 + $0x38] sm:$0xff]  ;;  %v2622_v14 = vld [vmem:[%s4002_s9 + $0x40] sm:$0xff]  ;;  %v2623_v58 = vld [vmem:[%s4002_s9 + $0x48] sm:$0xff] }
 0xcc5   :  { %1996 = vst.msk [vmem:[#allocation2 + $0x18] sm:$0xff] %vm226_vm1, %v1994_v61  ;;  %v2386_v61 = vld [vmem:[%s4001_s7 + $0x28] sm:$0xff]  ;;  %v3209_v59 = vpack.c.bf16 %v2623_v58, %v2622_v14 }
 0xcc6   :  { %1995 = vst.msk [vmem:[#allocation2 + $0x10] sm:$0xff] %vm226_vm1, %v1993_v0  ;;  %v3056_v6 = vpop.f32.mrb[26].mxu0  ;;  %v2385_v0 = vld [vmem:[%s4001_s7 + $0x20] sm:$0xff]  ;;  %3188 = vmatpush1.bf16.msra.mxu0 %v3187_v60  ;;  %v2624_v60 = vld [vmem:[%s4002_s9 + $0x50] sm:$0xff] }
 0xcc7   :  { %v2189_v8 = vmul.f32 %v3349_v63, %v3056_v6  ;;  %v2179_v9 = vpop.f32.mrb[27].mxu0  ;;  %v3189_v63 = vpack.c.bf16 %v2388_v62, %v2386_v61  ;;  %v2387_v6 = vld [vmem:[%s4001_s7 + $0x30] sm:$0xff]  ;;  %v2625_v61 = vld [vmem:[%s4002_s9 + $0x58] sm:$0xff] }
 0xcc8   :  { %v2188_v1 = vmul.f32 %v3351_v7, %v2179_v9  ;;  %v3384_v7 = vmov 0.0   ;;  %v3213_v62 = vpack.c.bf16 %v2625_v61, %v2624_v60 }
 0xcc9   :  { %2194 = vrot.lane.b32.xlu0 %v2189_v8, %s3383_s24  ;;  %2477 = vmatprep.mubr.f32.mxu0 %v3384_v7  ;;  %v3191_v8 = vpack.c.bf16 %v2387_v6, %v2385_v0  ;;  %v2626_v0 = vld [vmem:[%s4002_s9 + $0x60] sm:$0xff] }
 0xcca   :  { %2192 = vrot.lane.b32.xlu1 %v2188_v1, %s3383_s24  ;;  %3190 = vmatprep.subr.bf16.mxu0 %v3189_v63  ;;  %v2627_v63 = vld [vmem:[%s4002_s9 + $0x68] sm:$0xff] }
 0xccb   :  { %3192 = vmatpush1.bf16.msra.mxu0 %v3191_v8  ;;  %v3217_v6 = vpack.c.bf16 %v2627_v63, %v2626_v0  ;;  %v2629_v8 = vld [vmem:[%s4002_s9 + $0x78] sm:$0xff] }
 0xd33   :  { %v1800_v3 = vpop.permute.xlu1 %1799 }
 0xd34   :  { %1804 = vst.msk [vmem:[#allocation2 + $0x8] sm:$0xff] %vm629_vm3, %v1800_v3  ;;  %v1798_v10 = vpop.permute.xlu0 %1797 }
 0xd35   :  { %1803 = vst.msk [vmem:[#allocation2] sm:$0xff] %vm629_vm3, %v1798_v10 }
 0xd3b   :  { %v2195_v5 = vpop.permute.xlu0 %2194  ;;  %v2201_v13 = vld [vmem:[#allocation2 + $0x8] sm:$0xff] }
 0xd3c   :  { %2199 = vst.msk [vmem:[#allocation2 + $0x18] sm:$0xff] %vm629_vm3, %v2195_v5  ;;  %v2193_v11 = vpop.permute.xlu1 %2192  ;;  %v2200_v12 = vld [vmem:[#allocation2] sm:$0xff] }
 0xd3d   :  { %2198 = vst.msk [vmem:[#allocation2 + $0x10] sm:$0xff] %vm629_vm3, %v2193_v11  ;;  %3065 = vmatprep.mubr.msk.f32.mxu1 %vm49_vm0, %v2200_v12 }
 0xd3e   :  { %3066 = vmatmul.mubr.msk.f32.vlgmr.msra.gmra.mrb[18].mxu1 %vm49_vm0, %v2201_v13 }
 0xd43   :  { %v2203_v16 = vld [vmem:[#allocation2 + $0x18] sm:$0xff] }
 0xd44   :  { %v2202_v15 = vld [vmem:[#allocation2 + $0x10] sm:$0xff] }
 0xd45   :  { %3068 = vmatprep.mubr.msk.f32.mxu1 %vm49_vm0, %v2202_v15 }
 0xd46   :  { %3069 = vmatmul.mubr.msk.f32.gmra.mrb[20].mxu1 %vm49_vm0, %v2203_v16 }
 0xe11   :  { %v3067_v18 = vpop.f32.mrb[18].mxu1 }
 0xe12   :  { %v2296_v19 = vadd.f32 %v3067_v18, %v2211_v17  ;;  %v2290_v20 = vpop.f32.mrb[19].mxu1  ;;  %v2367_v18 = vsub.s32 4, %v3498_v42 }
 0xe13   :  { %v2291_v22 = vadd.f32 %v2290_v20, %v2211_v17  ;;  %v2375_v20 = vsub.s32 5, %v3498_v42 }
 0xe14   :  { %v3801_v23 = vadd.f32 %v2296_v19, %v3649_v53 }
 0xe15   :  { %v3804_v24 = vadd.f32 %v2291_v22, %v3652_v54 }
 0xe16   :  { %v2316_v25 = vsel %vm49_vm0, %v3801_v23, 0.0 }
 0xe17   :  { %2317 = vadd.xlane.f32.xlu0 %v2316_v25  ;;  %v2313_v26 = vsel %vm49_vm0, %v3804_v24, 0.0  ;;  %v3376_v25 = vld [vmem:[%s3994_s10] sm:$0x3f] }
 0xe18   :  { %2314 = vadd.xlane.f32.xlu1 %v2313_v26  ;;  %v2368_v26 = vrot.slane %v3376_v25, %v2367_v18 }
 0xe19   :  { %v3070_v27 = vpop.f32.mrb[20].mxu1 }
 0xe1a   :  { %v2306_v44 = vadd.f32 %v3070_v27, %v2211_v17  ;;  %v2300_v28 = vpop.f32.mrb[21].mxu1 }
 0xe1b   :  { %v2301_v29 = vadd.f32 %v2300_v28, %v2211_v17  ;;  %v2376_v28 = vrot.slane %v3376_v25, %v2375_v20 }
 0xe1c   :  { %v3811_v30 = vadd.f32 %v2306_v44, %v3663_v4 }
 0xe1d   :  { %v3814_v53 = vadd.f32 %v2301_v29, %v3659_v2 }
 0xe1e   :  { %v2322_v54 = vsel %vm49_vm0, %v3811_v30, 0.0 }
 0xe1f   :  { %2323 = vadd.xlane.f32.xlu1 %v2322_v54  ;;  %v2319_v32 = vsel %vm49_vm0, %v3814_v53, 0.0 }
 0xe20   :  { %2320 = vadd.xlane.f32.xlu0 %v2319_v32 }
 0xea4   :  { %v2318_v33 = vpop.xlane.xlu0 %2317 }
 0xea5   :  { %v2326_v31 = vmul.f32 0.03125, %v2318_v33  ;;  %v2315_v37 = vpop.xlane.xlu1 %2314 }
 0xea6   :  { %v2325_v35 = vmul.f32 0.03125, %v2315_v37 }
 0xea7   :  { %v3821_v21 = vsub.f32 %v3801_v23, %v2326_v31 }
 0xea8   :  { %v2329_v4 = vsub.f32 %v3804_v24, %v2325_v35 }
 0xea9   :  { %v2334_v2 = vmul.f32 %v3821_v21, %v3821_v21 }
 0xeaa   :  { %v2333_v38 = vmul.f32 %v2329_v4, %v2329_v4 }
 0xeab   :  { %v2340_v39 = vsel %vm49_vm0, %v2334_v2, 0.0 }
 0xeac   :  { %2341 = vadd.xlane.f32.xlu1 %v2340_v39  ;;  %v2324_v34 = vpop.xlane.xlu1 %2323  ;;  %v2337_v40 = vsel %vm49_vm0, %v2333_v38, 0.0 }
 0xead   :  { %v2328_v41 = vmul.f32 0.03125, %v2324_v34  ;;  %v2321_v43 = vpop.xlane.xlu0 %2320  ;;  %2338 = vadd.xlane.f32.xlu0 %v2337_v40  ;;  %v2614_v40 = vld [vmem:[%s4002_s9] sm:$0xff] }
 0xeae   :  { %v2327_v45 = vmul.f32 0.03125, %v2321_v43 }
 0xeaf   :  { %v2332_v46 = vsub.f32 %v3811_v30, %v2328_v41  ;;  %v2615_v41 = vld [vmem:[%s4002_s9 + $0x8] sm:$0xff] }
 0xeb0   :  { %v2331_v48 = vsub.f32 %v3814_v53, %v2327_v45  ;;  %v3193_v43 = vpack.c.bf16 %v2615_v41, %v2614_v40  ;;  %v2616_v45 = vld [vmem:[%s4002_s9 + $0x10] sm:$0xff] }
 0xeb1   :  { %v2336_v51 = vmul.f32 %v2332_v46, %v2332_v46 }
 0xeb2   :  { %v2335_v52 = vmul.f32 %v2331_v48, %v2331_v48  ;;  %3194 = vmatprep.subr.bf16.mxu1 %v3193_v43 }
 0xeb3   :  { %v2346_v49 = vsel %vm49_vm0, %v2336_v51, 0.0  ;;  %3196 = vmatpush3.bf16.msra.mxu1 %v3193_v43  ;;  %v2618_v51 = vld [vmem:[%s4002_s9 + $0x20] sm:$0xff] }
 0xeb4   :  { %2347 = vadd.xlane.f32.xlu1 %v2346_v49  ;;  %v2343_v55 = vsel %vm49_vm0, %v2335_v52, 0.0  ;;  %v2619_v52 = vld [vmem:[%s4002_s9 + $0x28] sm:$0xff] }
 0xeb5   :  { %2344 = vadd.xlane.f32.xlu0 %v2343_v55  ;;  %v3201_v49 = vpack.c.bf16 %v2619_v52, %v2618_v51  ;;  %v2620_v55 = vld [vmem:[%s4002_s9 + $0x30] sm:$0xff] }
 0xeb6   :  { %v3205_v57 = vpack.c.bf16 %v2621_v56, %v2620_v55 }
 0xf39   :  { %v2342_v9 = vpop.xlane.xlu1 %2341 }
 0xf3a   :  { %v2350_v1 = vmul.f32 0.03125, %v2342_v9  ;;  %v2339_v3 = vpop.xlane.xlu0 %2338 }
 0xf3b   :  { %v2349_v10 = vmul.f32 0.03125, %v2339_v3 }
 0xf3c   :  { %v2354_v5 = vadd.f32 1e-05, %v2350_v1  ;;  %v3917_v1 = vld [vmem:[%s4003_s8] sm:$0x3] }
 0xf3d   :  { %v2353_v11 = vadd.f32 1e-05, %v2349_v10  ;;  %v2398_v3 = vrot.slane %v3917_v1, %v3509_v50 }
 0xf3e   :  { %3352 = vrsqrt.f32 %v2354_v5 }
 0xf3f   :  { %3354 = vrsqrt.f32 %v2353_v11 }
 0xf41   :  { %v2348_v12 = vpop.xlane.xlu1 %2347 }
 0xf42   :  { %v2352_v13 = vmul.f32 0.03125, %v2348_v12  ;;  %v2345_v15 = vpop.xlane.xlu0 %2344 }
 0xf43   :  { %v2351_v16 = vmul.f32 0.03125, %v2345_v15 }
 0xf44   :  { %v2356_v17 = vadd.f32 1e-05, %v2352_v13 }
 0xf45   :  { %v2355_v19 = vadd.f32 1e-05, %v2351_v16 }
 0xf46   :  { %3356 = vrsqrt.f32 %v2356_v17 }
 0xf47   :  { %3358 = vrsqrt.f32 %v2355_v19 }
 0xf48   :  { %v3353_v22 = vpop.eup %3352 }
 0xf49   :  { %v3355_v27 = vpop.eup %3354  ;;  %v2362_v29 = vmul.f32 %v3353_v22, %v3821_v21 }
 0xf4a   :  { %v2361_v44 = vmul.f32 %v3355_v27, %v2329_v4 }
 0xf4b   :  { %v2370_v33 = vmul.f32 %v2368_v26, %v2362_v29 }
 0xf4c   :  { %v2369_v54 = vmul.f32 %v2368_v26, %v2361_v44 }
 0xf4d   :  { %v2378_v35 = vadd.f32 %v2376_v28, %v2370_v33 }
 0xf4e   :  { %v2377_v32 = vadd.f32 %v2376_v28, %v2369_v54 }
 0xf50   :  { %v3357_v31 = vpop.eup %3356  ;;  %2793 = vmatmul.mubr.msk.f32.vlgmr.msra.gmra.mrb[28].mxu0 %vm49_vm0, %v2377_v32 }
 0xf51   :  { %v3359_v37 = vpop.eup %3358  ;;  %2483 = vmatprep.mubr.f32.mxu0 %v3384_v7  ;;  %v2364_v38 = vmul.f32 %v3357_v31, %v2332_v46  ;;  %v2617_v46 = vld [vmem:[%s4002_s9 + $0x18] sm:$0xff] }
 0xf52   :  { %v2363_v2 = vmul.f32 %v3359_v37, %v2331_v48  ;;  %v3197_v48 = vpack.c.bf16 %v2617_v46, %v2616_v45 }
 0xf53   :  { %v2372_v4 = vmul.f32 %v2368_v26, %v2364_v38 }
 0xf54   :  { %2794 = vmatmul.mubr.msk.f32.gmra.mrb[30].mxu0 %vm49_vm0, %v2378_v35  ;;  %v2371_v39 = vmul.f32 %v2368_v26, %v2363_v2  ;;  %3198 = vmatprep.subr.bf16.mxu1 %v3197_v48 }
 0xf55   :  { %2489 = vmatprep.mubr.f32.mxu0 %v3384_v7  ;;  %v2380_v21 = vadd.f32 %v2376_v28, %v2372_v4  ;;  %3200 = vmatpush3.bf16.msra.mxu1 %v3197_v48 }
 0xf56   :  { %v2379_v34 = vadd.f32 %v2376_v28, %v2371_v39  ;;  %3202 = vmatprep.subr.bf16.mxu1 %v3201_v49 }
 0xf58   :  { %2795 = vmatmul.mubr.msk.f32.gmra.mrb[32].mxu0 %vm49_vm0, %v2379_v34 }
 0xf59   :  { %2495 = vmatprep.mubr.f32.mxu0 %v3384_v7  ;;  %3204 = vmatpush3.bf16.msra.mxu1 %v3201_v49  ;;  %v2628_v7 = vld [vmem:[%s4002_s9 + $0x70] sm:$0xff] }
 0xf5a   :  { %3206 = vmatprep.subr.bf16.mxu1 %v3205_v57  ;;  %v3221_v9 = vpack.c.bf16 %v2629_v8, %v2628_v7 }
 0xf5c   :  { %2796 = vmatmul.mubr.msk.f32.gmra.mrb[34].mxu0 %vm49_vm0, %v2380_v21 }
 0xf5d   :  { %3208 = vmatpush3.bf16.msra.mxu1 %v3205_v57 }
 0xf5e   :  { %3210 = vmatprep.subr.bf16.mxu1 %v3209_v59 }
 0xf61   :  { %3212 = vmatpush3.bf16.msra.mxu1 %v3209_v59 }
 0xf62   :  { %3214 = vmatprep.subr.bf16.mxu1 %v3213_v62 }
 0xf65   :  { %3216 = vmatpush3.bf16.msra.mxu1 %v3213_v62 }
 0xf66   :  { %3218 = vmatprep.subr.bf16.mxu1 %v3217_v6 }
 0xf69   :  { %3220 = vmatpush3.bf16.msra.mxu1 %v3217_v6 }
 0xf6a   :  { %3222 = vmatprep.subr.bf16.mxu1 %v3221_v9 }
 0xf6d   :  { %3224 = vmatpush3.bf16.msra.mxu1 %v3221_v9 }
0x1023   :  { %v3921_v10 = vpop.f32.mrb[28].mxu0 }
0x1024   :  { %v2481_v5 = vpop.f32.mrb[29].mxu0 }
0x1025   :  { %v3923_v11 = vadd.f32 %v2481_v5, %v2398_v3 }
0x1027   :  { %v3926_v12 = vmul.f32 0.70710677, %v3923_v11  ;;  %v3928_v13 = vpop.f32.mrb[30].mxu0 }
0x1028   :  { %v2487_v15 = vpop.f32.mrb[31].mxu0 }
0x1029   :  { %v2510_v16 = vand.u32 2147483647, %v3926_v12  ;;  %v3931_v17 = vadd.f32 %v2487_v15, %v2398_v3  ;;  %vm2590_vm6 = vcmp.ge.f32.partialorder %v3926_v12, 0.0 }
0x102b   :  { %v2514_v18 = vmul.f32 0.3275911, %v2510_v16  ;;  %v3934_v19 = vmul.f32 0.70710677, %v3931_v17  ;;  %v3936_v50 = vpop.f32.mrb[32].mxu0  ;;  %v2566_v35 = vsub.f32 0.0, %v2510_v16 }
0x102c   :  { %v2493_v25 = vpop.f32.mrb[33].mxu0 }
0x102d   :  { %v2518_v20 = vadd.f32 1.0, %v2514_v18  ;;  %v2511_v22 = vand.u32 2147483647, %v3934_v19  ;;  %v3939_v26 = vadd.f32 %v2493_v25, %v2398_v3  ;;  %v2570_v4 = vmul.f32 %v2566_v35, %v2510_v16 }
0x102e   :  { %vm2591_vm7 = vcmp.ge.f32.partialorder %v3934_v19, 0.0 }
0x102f   :  { %3360 = vrcp.f32 %v2518_v20  ;;  %v2515_v27 = vmul.f32 0.3275911, %v2511_v22  ;;  %v3941_v44 = vpop.f32.mrb[34].mxu0  ;;  %v3944_v28 = vmul.f32 0.70710677, %v3939_v26  ;;  %v2567_v21 = vsub.f32 0.0, %v2511_v22 }
0x1030   :  { %v2499_v29 = vpop.f32.mrb[35].mxu0  ;;  %v2574_v46 = vmul.f32 1.442695, %v2570_v4 }
0x1031   :  { %v2519_v54 = vadd.f32 1.0, %v2515_v27  ;;  %v3946_v32 = vadd.f32 %v2499_v29, %v2398_v3  ;;  %v2512_v33 = vand.u32 2147483647, %v3944_v28  ;;  %v2571_v48 = vmul.f32 %v2567_v21, %v2511_v22 }
0x1032   :  { %vm2592_vm8 = vcmp.ge.f32.partialorder %v3944_v28, 0.0 }
0x1033   :  { %3362 = vrcp.f32 %v2519_v54  ;;  %v3950_v31 = vmul.f32 0.70710677, %v3946_v32  ;;  %v2516_v37 = vmul.f32 0.3275911, %v2512_v33  ;;  %v2568_v49 = vsub.f32 0.0, %v2512_v33 }
0x1034   :  { %v2576_v57 = vmul.f32 1.442695, %v2571_v48 }
0x1035   :  { %v2513_v2 = vand.u32 2147483647, %v3950_v31  ;;  %v2520_v38 = vadd.f32 1.0, %v2516_v37  ;;  %v2572_v61 = vmul.f32 %v2568_v49, %v2512_v33  ;;  %vm2593_vm9 = vcmp.ge.f32.partialorder %v3950_v31, 0.0 }
0x1037   :  { %v2517_v39 = vmul.f32 0.3275911, %v2513_v2  ;;  %3364 = vrcp.f32 %v2520_v38  ;;  %v2569_v14 = vsub.f32 0.0, %v2513_v2  ;;  %v2578_v5 = vmul.f32 1.442695, %v2572_v61 }
0x1039   :  { %v3361_v34 = vpop.eup %3360  ;;  %v2521_v40 = vadd.f32 1.0, %v2517_v39  ;;  %v2573_v8 = vmul.f32 %v2569_v14, %v2513_v2  ;;  %v2502_v14 = vmul.f32 0.5, %v3923_v11 }
0x103a   :  { %v2530_v41 = vmul.f32 1.0614054, %v3361_v34 }
0x103b   :  { %3366 = vrcp.f32 %v2521_v40  ;;  %v2580_v27 = vmul.f32 1.442695, %v2573_v8  ;;  %v2503_v8 = vmul.f32 0.5, %v3931_v17 }
0x103c   :  { %v2534_v43 = vadd.f32 -1.4531521, %v2530_v41  ;;  %3368 = vpow2.f32 %v2574_v46 }
0x103d   :  { %v3363_v45 = vpop.eup %3362  ;;  %3370 = vpow2.f32 %v2576_v57 }
0x103e   :  { %v2538_v51 = vmul.f32 %v3361_v34, %v2534_v43  ;;  %v2531_v52 = vmul.f32 1.0614054, %v3363_v45  ;;  %3372 = vpow2.f32 %v2578_v5 }
0x103f   :  { %3374 = vpow2.f32 %v2580_v27 }
0x1040   :  { %v2542_v55 = vadd.f32 1.4214138, %v2538_v51  ;;  %v2535_v56 = vadd.f32 -1.4531521, %v2531_v52 }
0x1041   :  { %v3365_v58 = vpop.eup %3364 }
0x1042   :  { %v2546_v59 = vmul.f32 %v3361_v34, %v2542_v55  ;;  %v2539_v60 = vmul.f32 %v3363_v45, %v2535_v56  ;;  %v2532_v62 = vmul.f32 1.0614054, %v3365_v58 }
0x1044   :  { %v2550_v0 = vadd.f32 -0.28449672, %v2546_v59  ;;  %v2543_v63 = vadd.f32 1.4214138, %v2539_v60  ;;  %v2536_v7 = vadd.f32 -1.4531521, %v2532_v62 }
0x1045   :  { %v3367_v6 = vpop.eup %3366 }
0x1046   :  { %v2554_v9 = vmul.f32 %v3361_v34, %v2550_v0  ;;  %v2547_v3 = vmul.f32 %v3363_v45, %v2543_v63  ;;  %v2533_v15 = vmul.f32 1.0614054, %v3367_v6  ;;  %v2540_v16 = vmul.f32 %v3365_v58, %v2536_v7  ;;  %v3369_v37 = vpop.eup %3368 }
0x1047   :  { %v3371_v43 = vpop.eup %3370 }
0x1048   :  { %v2558_v18 = vadd.f32 0.2548296, %v2554_v9  ;;  %v2551_v20 = vadd.f32 -0.28449672, %v2547_v3  ;;  %v2537_v22 = vadd.f32 -1.4531521, %v2533_v15 }
0x1049   :  { %v2544_v25 = vadd.f32 1.4214138, %v2540_v16 }
0x104a   :  { %v2562_v29 = vmul.f32 %v3361_v34, %v2558_v18  ;;  %v2555_v54 = vmul.f32 %v3363_v45, %v2551_v20  ;;  %v2541_v33 = vmul.f32 %v3367_v6, %v2537_v22  ;;  %v2394_v34 = vrot.slane %v3917_v1, %v3501_v47 }
0x104b   :  { %v2548_v35 = vmul.f32 %v3365_v58, %v2544_v25  ;;  %v2504_v20 = vmul.f32 0.5, %v3939_v26  ;;  %v3377_v26 = vld [vmem:[%s3996_s11] sm:$0x7] }
0x104c   :  { %v2582_v38 = vmul.f32 %v3369_v37, %v2562_v29  ;;  %v2559_v39 = vadd.f32 0.2548296, %v2555_v54  ;;  %v2545_v4 = vadd.f32 1.4214138, %v2541_v33  ;;  %v2480_v0 = vadd.f32 %v3921_v10, %v2394_v34 }
0x104d   :  { %v2552_v2 = vadd.f32 -0.28449672, %v2548_v35  ;;  %v2492_v17 = vadd.f32 %v3936_v50, %v2394_v34  ;;  %v2498_v28 = vadd.f32 %v3941_v44, %v2394_v34  ;;  %v2633_v31 = vrot.slane %v3377_v26, %v1209_v36 }
0x104e   :  { %v2586_v21 = vsub.f32 1.0, %v2582_v38  ;;  %v2563_v40 = vmul.f32 %v3363_v45, %v2559_v39  ;;  %v2549_v41 = vmul.f32 %v3367_v6, %v2545_v4  ;;  %v3373_v45 = vpop.eup %3372 }
0x104f   :  { %v2556_v46 = vmul.f32 %v3365_v58, %v2552_v2  ;;  %v3375_v12 = vpop.eup %3374 }
0x1050   :  { %v2594_v48 = vsub.f32 0.0, %v2586_v21  ;;  %v2583_v51 = vmul.f32 %v3371_v43, %v2563_v40  ;;  %v2553_v52 = vadd.f32 -0.28449672, %v2549_v41 }
0x1051   :  { %v2560_v49 = vadd.f32 0.2548296, %v2556_v46 }
0x1052   :  { %v2598_v55 = vsel %vm2590_vm6, %v2586_v21, %v2594_v48  ;;  %v2587_v56 = vsub.f32 1.0, %v2583_v51  ;;  %v2557_v57 = vmul.f32 %v3367_v6, %v2553_v52 }
0x1053   :  { %v2602_v59 = vadd.f32 1.0, %v2598_v55  ;;  %v2564_v60 = vmul.f32 %v3365_v58, %v2560_v49  ;;  %v2486_v58 = vadd.f32 %v3928_v13, %v2394_v34  ;;  %v2505_v13 = vmul.f32 0.5, %v3946_v32 }
0x1054   :  { %v2595_v61 = vsub.f32 0.0, %v2587_v56  ;;  %v2561_v62 = vadd.f32 0.2548296, %v2557_v57 }
0x1055   :  { %v2606_v63 = vmul.f32 %v2602_v59, %v2502_v14  ;;  %v2584_v7 = vmul.f32 %v3373_v45, %v2564_v60 }
0x1056   :  { %v2599_v47 = vsel %vm2591_vm7, %v2587_v56, %v2595_v61  ;;  %v2565_v1 = vmul.f32 %v3367_v6, %v2561_v62 }
0x1057   :  { %v2603_v9 = vadd.f32 1.0, %v2599_v47  ;;  %v2588_v3 = vsub.f32 1.0, %v2584_v7  ;;  %v2610_v5 = vmul.f32 %v2606_v63, %v2480_v0 }
0x1058   :  { %v2585_v11 = vmul.f32 %v3375_v12, %v2565_v1 }
0x1059   :  { %v2607_v15 = vmul.f32 %v2603_v9, %v2503_v8  ;;  %v2596_v16 = vsub.f32 0.0, %v2588_v3  ;;  %3103 = vmatprep.mubr.f32.mxu1 %v2610_v5 }
0x105a   :  { %v2589_v10 = vsub.f32 1.0, %v2585_v11 }
0x105b   :  { %v2611_v18 = vmul.f32 %v2607_v15, %v2486_v58  ;;  %v2600_v19 = vsel %vm2592_vm8, %v2588_v3, %v2596_v16 }
0x105c   :  { %v2604_v6 = vadd.f32 1.0, %v2600_v19  ;;  %v2597_v22 = vsub.f32 0.0, %v2589_v10 }
0x105d   :  { %3104 = vmatmul.mubr.f32.vlgmr.msra.gmra.mrb[22].mxu1 %v2611_v18 }
0x105e   :  { %v2608_v25 = vmul.f32 %v2604_v6, %v2504_v20  ;;  %v2601_v27 = vsel %vm2593_vm9, %v2589_v10, %v2597_v22 }
0x105f   :  { %v2605_v29 = vadd.f32 1.0, %v2601_v27 }
0x1060   :  { %v2612_v54 = vmul.f32 %v2608_v25, %v2492_v17 }
0x1061   :  { %v2609_v33 = vmul.f32 %v2605_v29, %v2505_v13 }
0x1062   :  { %3106 = vmatprep.mubr.f32.mxu1 %v2612_v54 }
0x1063   :  { %v2613_v37 = vmul.f32 %v2609_v33, %v2498_v28 }
0x1065   :  { %3107 = vmatmul.mubr.f32.gmra.mrb[24].mxu1 %v2613_v37 }
0x1130   :  { %v3105_v50 = vpop.f32.mrb[22].mxu1 }
0x1131   :  { %v2706_v35 = vadd.f32 %v3105_v50, %v2633_v31  ;;  %v2700_v38 = vpop.f32.mrb[23].mxu1 }
0x1132   :  { %v2701_v39 = vadd.f32 %v2700_v38, %v2633_v31 }
0x1133   :  { %v2720_v32 = vadd.f32 %v2706_v35, %v3801_v23 }
0x1134   :  { %v2719_v4 = vadd.f32 %v2701_v39, %v3804_v24 }
0x1135   :  { %2724 = vst.msk [vmem:[%s4004_s12 + $0x8] sm:$0xff] %vm49_vm0, %v2720_v32 }
0x1136   :  { %2723 = vst.msk [vmem:[%s4004_s12] sm:$0xff] %vm49_vm0, %v2719_v4 }
0x1138   :  { %v3108_v42 = vpop.f32.mrb[24].mxu1 }
0x1139   :  { %v2716_v36 = vadd.f32 %v3108_v42, %v2633_v31  ;;  %v2710_v44 = vpop.f32.mrb[25].mxu1 }
0x113a   :  { %v2711_v2 = vadd.f32 %v2710_v44, %v2633_v31 }
0x113b   :  { %v2722_v21 = vadd.f32 %v2716_v36, %v3811_v30 }
0x113c   :  { %v2721_v23 = vadd.f32 %v2711_v2, %v3814_v53 }
0x113d   :  { %2726 = vst.msk [vmem:[%s4004_s12 + $0x18] sm:$0xff] %vm49_vm0, %v2722_v21 }
0x113e   :  { %2725 = vst.msk [vmem:[%s4004_s12 + $0x10] sm:$0xff] %vm49_vm0, %v2721_v23 }

</bundles_post_ra>
